<compile_context>
chip_gen: v7x
topology: tpu7x:2x2x1
jax: 0.10.0
libtpu: 0.0.40
codegen_flags: <defaults>
</compile_context>

<pallas_src>
import functools
import math

import jax
import jax.numpy as jnp
from jax import lax
from jax.experimental import pallas as pl
from jax.experimental.pallas import tpu as pltpu


def _round_up(x, m):
    return (x + m - 1) // m * m


# ----------------------------- Tiled linear (matmul + bias [+ ReLU]) -----------------------------

def _linear_kernel(x_ref, w_ref, b_ref, o_ref, acc_ref, *, relu):
    # x: [tm, tk] bf16, w: [tn, tk] bf16 (PyTorch layout), b: [1, tn] f32, o: [tm, tn] f32
    @pl.when(pl.program_id(2) == 0)
    def _():
        acc_ref[...] = jnp.zeros_like(acc_ref)

    # Contract on the last dim of both operands -> no in-kernel weight transpose.
    acc_ref[...] += lax.dot_general(
        x_ref[...], w_ref[...],
        dimension_numbers=(((1,), (1,)), ((), ())),
        preferred_element_type=jnp.float32)

    @pl.when(pl.program_id(2) == pl.num_programs(2) - 1)
    def _():
        y = acc_ref[...] + b_ref[...]
        if relu:
            y = jnp.maximum(y, 0.0)
        o_ref[...] = y.astype(o_ref.dtype)


def linear(x2d, w, b, relu=False):
    """y = x @ w.T + b  (w is [N, K] PyTorch layout). x2d f32/bf16, returns f32."""
    M, K = x2d.shape
    N, Kw = w.shape
    assert K == Kw, (x2d.shape, w.shape)

    tm = min(128, _round_up(M, 8))
    tn = min(256, _round_up(N, 128))
    tk = min(512, _round_up(K, 128))
    Mp, Np, Kp = _round_up(M, tm), _round_up(N, tn), _round_up(K, tk)

    xb = jnp.pad(x2d.astype(jnp.bfloat16), ((0, Mp - M), (0, Kp - K)))
    wb = jnp.pad(w.astype(jnp.bfloat16), ((0, Np - N), (0, Kp - K)))
    bb = jnp.pad(b.astype(jnp.float32), (0, Np - N)).reshape(1, Np)

    grid = (Mp // tm, Np // tn, Kp // tk)
    cost = pl.CostEstimate(
        flops=2 * Mp * Np * Kp,
        transcendentals=0,
        bytes_accessed=(Mp * Kp + Np * Kp) * 2 + Np * 4 + Mp * Np * 4)

    out = pl.pallas_call(
        functools.partial(_linear_kernel, relu=relu),
        out_shape=jax.ShapeDtypeStruct((Mp, Np), jnp.float32),
        grid=grid,
        in_specs=[
            pl.BlockSpec((tm, tk), lambda i, j, k: (i, k)),
            pl.BlockSpec((tn, tk), lambda i, j, k: (j, k)),
            pl.BlockSpec((1, tn), lambda i, j, k: (0, j)),
        ],
        out_specs=pl.BlockSpec((tm, tn), lambda i, j, k: (i, j)),
        scratch_shapes=[pltpu.VMEM((tm, tn), jnp.float32)],
        compiler_params=pltpu.CompilerParams(
            dimension_semantics=("parallel", "parallel", "arbitrary"),
            vmem_limit_bytes=64 * 1024 * 1024),
        cost_estimate=cost,
    )(xb, wb, bb)

    if Mp != M or Np != N:
        out = out[:M, :N]
    return out


# ----------------------------- Fused residual-add + LayerNorm -----------------------------

def _add_ln_kernel(x_ref, r_ref, g_ref, b_ref, o_ref, *, eps):
    x = x_ref[...] + r_ref[...]                       # fused residual add
    mean = jnp.mean(x, axis=-1, keepdims=True)
    c = x - mean
    var = jnp.mean(c * c, axis=-1, keepdims=True)     # unbiased=False
    o_ref[...] = c * lax.rsqrt(var + eps) * g_ref[...] + b_ref[...]


def add_layernorm(x, res, p, eps=1e-12):
    B, S, D = x.shape
    M = B * S
    x2 = x.reshape(M, D)
    r2 = res.reshape(M, D)
    tm = min(256, _round_up(M, 8))
    Mp = _round_up(M, tm)
    if Mp != M:
        x2 = jnp.pad(x2, ((0, Mp - M), (0, 0)))
        r2 = jnp.pad(r2, ((0, Mp - M), (0, 0)))

    out = pl.pallas_call(
        functools.partial(_add_ln_kernel, eps=eps),
        out_shape=jax.ShapeDtypeStruct((Mp, D), jnp.float32),
        grid=(Mp // tm,),
        in_specs=[
            pl.BlockSpec((tm, D), lambda i: (i, 0)),
            pl.BlockSpec((tm, D), lambda i: (i, 0)),
            pl.BlockSpec((1, D), lambda i: (0, 0)),
            pl.BlockSpec((1, D), lambda i: (0, 0)),
        ],
        out_specs=pl.BlockSpec((tm, D), lambda i: (i, 0)),
        compiler_params=pltpu.CompilerParams(dimension_semantics=("parallel",)),
    )(x2, r2, p["gamma"].reshape(1, D), p["beta"].reshape(1, D))

    if Mp != M:
        out = out[:M]
    return out.reshape(B, S, D)


# ----------------------------- Fused multi-head attention core -----------------------------

def _mha_kernel(q_ref, k_ref, v_ref, qv_ref, kv_ref, o_ref, *, n_head, scale, causal):
    # q: [1, Sq, D] bf16, k/v: [1, Sk, D] bf16 ; qv: [1, Sq, 1], kv: [1, 1, Sk] int32
    Sq = q_ref.shape[1]
    Sk = k_ref.shape[1]
    D = q_ref.shape[2]
    Dh = D // n_head

    q = q_ref[0]
    k = k_ref[0]
    v = v_ref[0]

    # Build the attention mask in-kernel (no [B*H, Sq, Sk] mask in HBM).
    valid = (qv_ref[0] != 0) & (kv_ref[0] != 0)       # (Sq,1) & (1,Sk) -> (Sq,Sk)
    if causal:
        row = lax.broadcasted_iota(jnp.int32, (Sq, Sk), 0)
        col = lax.broadcasted_iota(jnp.int32, (Sq, Sk), 1)
        valid = valid & (row >= col)

    outs = []
    for h in range(n_head):                           # all heads of this batch in one step
        sl = slice(h * Dh, (h + 1) * Dh)
        qh = q[:, sl]
        kh = k[:, sl]
        vh = v[:, sl]
        # scores: contract the head dim of both operands (no K transpose).
        s = lax.dot_general(qh, kh, (((1,), (1,)), ((), ())),
                            preferred_element_type=jnp.float32) * scale
        s = jnp.where(valid, s, -10000.0)             # masked_fill(mask == 0, -10000)
        s = s - jnp.max(s, axis=-1, keepdims=True)
        p = jnp.exp(s)
        p = p * pl.reciprocal(jnp.sum(p, axis=-1, keepdims=True), approx=True)
        outs.append(jnp.dot(p.astype(vh.dtype), vh, preferred_element_type=jnp.float32))

    o_ref[0] = jnp.concatenate(outs, axis=-1).astype(o_ref.dtype)


def mha_attention(q, k, v, q_valid, k_valid, causal, n_head):
    # q: [B, Sq, D] bf16, k/v: [B, Sk, D] bf16, q_valid: [B, Sq, 1] i32, k_valid: [B, 1, Sk] i32
    # TODO(synk): for long sequences this should be a flash-style online-softmax loop over
    #             Sk tiles; at these shapes the full score matrix per batch fits VMEM easily.
    B, Sq, D = q.shape
    Sk = k.shape[1]
    Dh = D // n_head
    scale = 1.0 / math.sqrt(Dh)

    return pl.pallas_call(
        functools.partial(_mha_kernel, n_head=n_head, scale=scale, causal=causal),
        out_shape=jax.ShapeDtypeStruct((B, Sq, D), jnp.float32),
        grid=(B,),
        in_specs=[
            pl.BlockSpec((1, Sq, D), lambda b: (b, 0, 0)),
            pl.BlockSpec((1, Sk, D), lambda b: (b, 0, 0)),
            pl.BlockSpec((1, Sk, D), lambda b: (b, 0, 0)),
            pl.BlockSpec((1, Sq, 1), lambda b: (b, 0, 0)),
            pl.BlockSpec((1, 1, Sk), lambda b: (b, 0, 0)),
        ],
        out_specs=pl.BlockSpec((1, Sq, D), lambda b: (b, 0, 0)),
        compiler_params=pltpu.CompilerParams(
            dimension_semantics=("parallel",),
            vmem_limit_bytes=64 * 1024 * 1024),
    )(q, k, v, q_valid, k_valid)


# ----------------------------- Model glue (plain JAX between kernels) -----------------------------

def multi_head_attention(q_in, kv_in, q_valid, k_valid, causal, p, n_head):
    B, Sq, D = q_in.shape
    Sk = kv_in.shape[1]

    if "wqkv" in p:
        # self-attention: fused Q/K/V projection in a single matmul
        qkv = linear(q_in.reshape(B * Sq, D), p["wqkv"], p["bqkv"])
        q2, k2, v2 = qkv[:, :D], qkv[:, D:2 * D], qkv[:, 2 * D:]
    else:
        # cross-attention: separate Q, fused K/V projection
        q2 = linear(q_in.reshape(B * Sq, D), p["wq"], p["bq"])
        kv = linear(kv_in.reshape(B * Sk, D), p["wkv"], p["bkv"])
        k2, v2 = kv[:, :D], kv[:, D:]

    q3 = q2.reshape(B, Sq, D).astype(jnp.bfloat16)
    k3 = k2.reshape(B, Sk, D).astype(jnp.bfloat16)
    v3 = v2.reshape(B, Sk, D).astype(jnp.bfloat16)

    ctx = mha_attention(q3, k3, v3, q_valid, k_valid, causal, n_head)   # [B, Sq, D] f32
    out = linear(ctx.reshape(B * Sq, D), p["wo"], p["bo"])
    return out.reshape(B, Sq, D)


def feed_forward(x, p):
    B, S, D = x.shape
    h = linear(x.reshape(B * S, D), p["w1"], p["b1"], relu=True)   # Linear -> ReLU fused
    # TODO(synk): dropout between the two FFN linears omitted (eval-mode identity)
    y = linear(h, p["w2"], p["b2"])
    return y.reshape(B, S, D)


def positional_encoding(max_len, d_model):
    pos = jnp.arange(max_len, dtype=jnp.float32)[:, None]
    _2i = jnp.arange(0, d_model, 2, dtype=jnp.float32)
    angles = pos / (10000.0 ** (_2i / d_model))
    enc = jnp.zeros((max_len, d_model), jnp.float32)
    enc = enc.at[:, 0::2].set(jnp.sin(angles))
    enc = enc.at[:, 1::2].set(jnp.cos(angles))
    return enc


def transformer_embedding(tokens, tok_table, pos_enc):
    # tok_emb + pos_emb ; dropout is identity
    S = tokens.shape[1]
    return jnp.take(tok_table, tokens, axis=0) + pos_enc[:S][None, :, :]


def encoder_layer(x, ones_q_src, src_k_valid, p, n_head):
    _x = x
    x = multi_head_attention(x, x, ones_q_src, src_k_valid, False, p["attn"], n_head)
    x = add_layernorm(x, _x, p["ln1"])
    _x = x
    x = feed_forward(x, p["ffn"])
    x = add_layernorm(x, _x, p["ln2"])
    return x


def decoder_layer(dec, enc, trg_q_valid, ones_k_trg, ones_q_trg, src_k_valid, p, n_head):
    _x = dec
    x = multi_head_attention(dec, dec, trg_q_valid, ones_k_trg, True, p["self_attn"], n_head)
    x = add_layernorm(x, _x, p["ln1"])
    _x = x
    x = multi_head_attention(x, enc, ones_q_trg, src_k_valid, False, p["cross_attn"], n_head)
    x = add_layernorm(x, _x, p["ln2"])
    _x = x
    x = feed_forward(x, p["ffn"])
    x = add_layernorm(x, _x, p["ln3"])
    return x


def transformer_forward(src, trg, params, cfg):
    n_head = cfg["n_head"]
    B, Ss = src.shape
    St = trg.shape[1]

    # Mask semantics of the reference:
    #   src_mask[b,1,1,k] = (src[b,k] != pad)            -> key-side validity
    #   trg_mask[b,1,q,k] = (trg[b,q] != pad) & (q >= k) -> query-side pad + causal
    src_valid = (src != cfg["src_pad_idx"]).astype(jnp.int32)      # [B, Ss]
    trg_valid = (trg != cfg["trg_pad_idx"]).astype(jnp.int32)      # [B, St]
    src_k_valid = src_valid.reshape(B, 1, Ss)
    trg_q_valid = trg_valid.reshape(B, St, 1)
    ones_q_src = jnp.ones((B, Ss, 1), jnp.int32)
    ones_q_trg = jnp.ones((B, St, 1), jnp.int32)
    ones_k_trg = jnp.ones((B, 1, St), jnp.int32)

    # ---------------- Encoder ----------------
    x = transformer_embedding(src, params["enc_tok_emb"], params["pos_enc"])
    for lp in params["enc_layers"]:
        x = encoder_layer(x, ones_q_src, src_k_valid, lp, n_head)
    enc_out = x

    # ---------------- Decoder ----------------
    y = transformer_embedding(trg, params["dec_tok_emb"], params["pos_enc"])
    for lp in params["dec_layers"]:
        y = decoder_layer(y, enc_out, trg_q_valid, ones_k_trg, ones_q_trg,
                          src_k_valid, lp, n_head)

    B_, S_, D_ = y.shape
    logits = linear(y.reshape(B_ * S_, D_), params["out_w"], params["out_b"])
    return logits.reshape(B_, S_, cfg["dec_voc_size"])


# ----------------------------- Parameter init -----------------------------

def _init_linear(key, out_dim, in_dim):
    w = jax.random.normal(key, (out_dim, in_dim), jnp.float32) * 0.02
    b = jnp.zeros((out_dim,), jnp.float32)
    return w, b


def _init_self_attn(key, d_model):
    ks = jax.random.split(key, 4)
    wq, bq = _init_linear(ks[0], d_model, d_model)
    wk, bk = _init_linear(ks[1], d_model, d_model)
    wv, bv = _init_linear(ks[2], d_model, d_model)
    wo, bo = _init_linear(ks[3], d_model, d_model)
    return dict(wqkv=jnp.concatenate([wq, wk, wv], axis=0).astype(jnp.bfloat16),
                bqkv=jnp.concatenate([bq, bk, bv]),
                wo=wo.astype(jnp.bfloat16), bo=bo)


def _init_cross_attn(key, d_model):
    ks = jax.random.split(key, 4)
    wq, bq = _init_linear(ks[0], d_model, d_model)
    wk, bk = _init_linear(ks[1], d_model, d_model)
    wv, bv = _init_linear(ks[2], d_model, d_model)
    wo, bo = _init_linear(ks[3], d_model, d_model)
    return dict(wq=wq.astype(jnp.bfloat16), bq=bq,
                wkv=jnp.concatenate([wk, wv], axis=0).astype(jnp.bfloat16),
                bkv=jnp.concatenate([bk, bv]),
                wo=wo.astype(jnp.bfloat16), bo=bo)


def _init_ln(d_model):
    return dict(gamma=jnp.ones((d_model,), jnp.float32),
                beta=jnp.zeros((d_model,), jnp.float32))


def _init_ffn(key, d_model, hidden):
    k1, k2 = jax.random.split(key)
    w1, b1 = _init_linear(k1, hidden, d_model)
    w2, b2 = _init_linear(k2, d_model, hidden)
    return dict(w1=w1.astype(jnp.bfloat16), b1=b1,
                w2=w2.astype(jnp.bfloat16), b2=b2)


def init_params(key, cfg):
    d_model = cfg["d_model"]
    keys = jax.random.split(key, 8)

    enc_tok = jax.random.normal(keys[0], (cfg["enc_voc_size"], d_model), jnp.float32) * 0.02
    dec_tok = jax.random.normal(keys[1], (cfg["dec_voc_size"], d_model), jnp.float32) * 0.02
    # nn.Embedding padding_idx=1 -> zero row
    enc_tok = enc_tok.at[1].set(0.0)
    dec_tok = dec_tok.at[1].set(0.0)

    enc_layers = []
    ek = jax.random.split(keys[2], cfg["n_layers"])
    for i in range(cfg["n_layers"]):
        k1, k2 = jax.random.split(ek[i])
        enc_layers.append(dict(attn=_init_self_attn(k1, d_model),
                               ln1=_init_ln(d_model),
                               ffn=_init_ffn(k2, d_model, cfg["ffn_hidden"]),
                               ln2=_init_ln(d_model)))

    dec_layers = []
    dk = jax.random.split(keys[3], cfg["n_layers"])
    for i in range(cfg["n_layers"]):
        k1, k2, k3 = jax.random.split(dk[i], 3)
        dec_layers.append(dict(self_attn=_init_self_attn(k1, d_model),
                               ln1=_init_ln(d_model),
                               cross_attn=_init_cross_attn(k2, d_model),
                               ln2=_init_ln(d_model),
                               ffn=_init_ffn(k3, d_model, cfg["ffn_hidden"]),
                               ln3=_init_ln(d_model)))

    out_w, out_b = _init_linear(keys[4], cfg["dec_voc_size"], d_model)

    return dict(enc_tok_emb=enc_tok,
                dec_tok_emb=dec_tok,
                pos_enc=positional_encoding(cfg["max_len"], d_model),
                enc_layers=enc_layers,
                dec_layers=dec_layers,
                out_w=out_w.astype(jnp.bfloat16), out_b=out_b)


# ----------------------------- Main -----------------------------

if __name__ == "__main__":
    cfg = dict(src_pad_idx=1, trg_pad_idx=1, trg_sos_idx=2,
               enc_voc_size=13, dec_voc_size=11,
               d_model=32, n_head=4, max_len=16,
               ffn_hidden=64, n_layers=2, drop_prob=0.1)

    root = jax.random.PRNGKey(0)
    kp, ks, kt = jax.random.split(root, 3)
    params = init_params(kp, cfg)

    B, S_src, S_trg = 2, 8, 8
    src = jax.random.randint(ks, (B, S_src), 2, cfg["enc_voc_size"], dtype=jnp.int32)
    trg = jax.random.randint(kt, (B, S_trg), 2, cfg["dec_voc_size"], dtype=jnp.int32)
    # sprinkle some pad tokens so the masks are non-trivial
    src = src.at[:, -2:].set(cfg["src_pad_idx"])
    trg = trg.at[0, -1].set(cfg["trg_pad_idx"])
    trg = trg.at[:, 0].set(cfg["trg_sos_idx"])

    fwd = jax.jit(lambda s, t, p: transformer_forward(s, t, p, cfg))
    out = fwd(src, trg, params)
    out = jax.block_until_ready(out)

    assert out.shape == (B, S_trg, cfg["dec_voc_size"]), out.shape
    assert bool(jnp.all(jnp.isfinite(out)))
    print("KERNEL_OK")
</pallas_src>

<mosaic_0001>
module attributes {stable_mosaic.version = 11 : i64} {
  func.func @_linear_kernel(%arg0: i32, %arg1: i32, %arg2: i32, %arg3: memref<16x128xbf16, #tpu.memory_space<vmem>>, %arg4: memref<128x128xbf16, #tpu.memory_space<vmem>>, %arg5: memref<1x128xf32, #tpu.memory_space<vmem>>, %arg6: memref<16x128xf32, #tpu.memory_space<vmem>>, %arg7: memref<16x128xf32, #tpu.memory_space<vmem>>) attributes {dimension_semantics = [#tpu.dimension_semantics<parallel>, #tpu.dimension_semantics<parallel>, #tpu.dimension_semantics<arbitrary>], iteration_bounds = array<i64: 1, 1, 1>, scalar_prefetch = 0 : i64, scratch_operands = 1 : i64, tpu.core_type = #tpu.core_type<tc>, window_params = [{transform_indices = @transform_0, window_bounds = array<i64: 16, 128>}, {transform_indices = @transform_1, window_bounds = array<i64: 128, 128>}, {transform_indices = @transform_2, window_bounds = array<i64: 1, 128>}, {transform_indices = @transform_3, window_bounds = array<i64: 16, 128>}]} {
    %c0_i32 = arith.constant 0 : i32
    %0 = arith.cmpi eq, %arg2, %c0_i32 : i32
    %1 = arith.extui %0 : i1 to i32
    %c0_i32_0 = arith.constant 0 : i32
    %2 = arith.cmpi ne, %1, %c0_i32_0 : i32
    scf.if %2 {
      %cst_10 = arith.constant 0.000000e+00 : f32
      %12 = vector.broadcast %cst_10 : f32 to vector<16x128xf32>
      %c0_11 = arith.constant 0 : index
      %c0_12 = arith.constant 0 : index
      %13 = vector.load %arg7[%c0_11, %c0_12] : memref<16x128xf32, #tpu.memory_space<vmem>>, vector<16x128xf32>
      tpu.vector_store %arg7[%c0_11, %c0_12], %12 {strides = array<i32>} : memref<16x128xf32, #tpu.memory_space<vmem>>, vector<16x128xf32>,
    } else {
    }
    %c0 = arith.constant 0 : index
    %c0_1 = arith.constant 0 : index
    %3 = vector.load %arg7[%c0, %c0_1] : memref<16x128xf32, #tpu.memory_space<vmem>>, vector<16x128xf32>
    %c0_2 = arith.constant 0 : index
    %c0_3 = arith.constant 0 : index
    %4 = vector.load %arg3[%c0_2, %c0_3] : memref<16x128xbf16, #tpu.memory_space<vmem>>, vector<16x128xbf16>
    %c0_4 = arith.constant 0 : index
    %c0_5 = arith.constant 0 : index
    %5 = vector.load %arg4[%c0_4, %c0_5] : memref<128x128xbf16, #tpu.memory_space<vmem>>, vector<128x128xbf16>
    %cst = arith.constant dense<0.000000e+00> : vector<16x128xf32>
    %6 = tpu.matmul %4, %5, %cst {dimension_numbers = #tpu.dot_dimension_numbers<[1], [1], [0], [0], [0, 0, 1, 0], [], []>} : vector<16x128xbf16>, vector<128x128xbf16>, vector<16x128xf32> -> vector<16x128xf32>
    %7 = arith.addf %3, %6 : vector<16x128xf32>
    %c0_6 = arith.constant 0 : index
    %c0_7 = arith.constant 0 : index
    %8 = vector.load %arg7[%c0_6, %c0_7] : memref<16x128xf32, #tpu.memory_space<vmem>>, vector<16x128xf32>
    tpu.vector_store %arg7[%c0_6, %c0_7], %7 {strides = array<i32>} : memref<16x128xf32, #tpu.memory_space<vmem>>, vector<16x128xf32>,
    %c0_i32_8 = arith.constant 0 : i32
    %9 = arith.cmpi eq, %arg2, %c0_i32_8 : i32
    %10 = arith.extui %9 : i1 to i32
    %c0_i32_9 = arith.constant 0 : i32
    %11 = arith.cmpi ne, %10, %c0_i32_9 : i32
    scf.if %11 {
      %c0_10 = arith.constant 0 : index
      %c0_11 = arith.constant 0 : index
      %12 = vector.load %arg7[%c0_10, %c0_11] : memref<16x128xf32, #tpu.memory_space<vmem>>, vector<16x128xf32>
      %c0_12 = arith.constant 0 : index
      %c0_13 = arith.constant 0 : index
      %13 = vector.load %arg5[%c0_12, %c0_13] : memref<1x128xf32, #tpu.memory_space<vmem>>, vector<1x128xf32>
      %14 = vector.broadcast %13 : vector<1x128xf32> to vector<16x128xf32>
      %15 = arith.addf %12, %14 : vector<16x128xf32>
      %c0_14 = arith.constant 0 : index
      %c0_15 = arith.constant 0 : index
      %16 = vector.load %arg6[%c0_14, %c0_15] : memref<16x128xf32, #tpu.memory_space<vmem>>, vector<16x128xf32>
      tpu.vector_store %arg6[%c0_14, %c0_15], %15 {strides = array<i32>} : memref<16x128xf32, #tpu.memory_space<vmem>>, vector<16x128xf32>,
    } else {
    }
    return
  }
  func.func @transform_0(%arg0: i32, %arg1: i32, %arg2: i32) -> (i32, i32) {
    %c0_i32 = arith.constant 0 : i32
    return %arg0, %arg2 : i32, i32
  }
  func.func @transform_1(%arg0: i32, %arg1: i32, %arg2: i32) -> (i32, i32) {
    %c0_i32 = arith.constant 0 : i32
    return %arg1, %arg2 : i32, i32
  }
  func.func @transform_2(%arg0: i32, %arg1: i32, %arg2: i32) -> (i32, i32) {
    %c0_i32 = arith.constant 0 : i32
    %c0_i32_0 = arith.constant 0 : i32
    return %c0_i32, %arg1 : i32, i32
  }
  func.func @transform_3(%arg0: i32, %arg1: i32, %arg2: i32) -> (i32, i32) {
    %c0_i32 = arith.constant 0 : i32
    return %arg0, %arg1 : i32, i32
  }
}

module attributes {stable_mosaic.version = 11 : i64} {
  func.func @_mha_kernel(%arg0: i32, %arg1: memref<1x8x32xbf16, #tpu.memory_space<vmem>>, %arg2: memref<1x8x32xbf16, #tpu.memory_space<vmem>>, %arg3: memref<1x8x32xbf16, #tpu.memory_space<vmem>>, %arg4: memref<1x8x1xi32, #tpu.memory_space<vmem>>, %arg5: memref<1x1x8xi32, #tpu.memory_space<vmem>>, %arg6: memref<1x8x32xf32, #tpu.memory_space<vmem>>) attributes {dimension_semantics = [#tpu.dimension_semantics<parallel>], iteration_bounds = array<i64: 2>, scalar_prefetch = 0 : i64, scratch_operands = 0 : i64, tpu.core_type = #tpu.core_type<tc>, window_params = [{transform_indices = @transform_0, window_bounds = array<i64: 1, 8, 32>}, {transform_indices = @transform_1, window_bounds = array<i64: 1, 8, 32>}, {transform_indices = @transform_2, window_bounds = array<i64: 1, 8, 32>}, {transform_indices = @transform_3, window_bounds = array<i64: 1, 8, 1>}, {transform_indices = @transform_4, window_bounds = array<i64: 1, 1, 8>}, {transform_indices = @transform_5, window_bounds = array<i64: 1, 8, 32>}]} {
    %c0 = arith.constant 0 : index
    %c0_0 = arith.constant 0 : index
    %c0_1 = arith.constant 0 : index
    %0 = vector.load %arg1[%c0, %c0_0, %c0_1] : memref<1x8x32xbf16, #tpu.memory_space<vmem>>, vector<1x8x32xbf16>
    %1 = vector.shape_cast %0 : vector<1x8x32xbf16> to vector<8x32xbf16>
    %c0_2 = arith.constant 0 : index
    %c0_3 = arith.constant 0 : index
    %c0_4 = arith.constant 0 : index
    %2 = vector.load %arg2[%c0_2, %c0_3, %c0_4] : memref<1x8x32xbf16, #tpu.memory_space<vmem>>, vector<1x8x32xbf16>
    %3 = vector.shape_cast %2 : vector<1x8x32xbf16> to vector<8x32xbf16>
    %c0_5 = arith.constant 0 : index
    %c0_6 = arith.constant 0 : index
    %c0_7 = arith.constant 0 : index
    %4 = vector.load %arg3[%c0_5, %c0_6, %c0_7] : memref<1x8x32xbf16, #tpu.memory_space<vmem>>, vector<1x8x32xbf16>
    %5 = vector.shape_cast %4 : vector<1x8x32xbf16> to vector<8x32xbf16>
    %c0_8 = arith.constant 0 : index
    %c0_9 = arith.constant 0 : index
    %c0_10 = arith.constant 0 : index
    %6 = vector.load %arg4[%c0_8, %c0_9, %c0_10] : memref<1x8x1xi32, #tpu.memory_space<vmem>>, vector<1x8x1xi32>
    %7 = vector.shape_cast %6 : vector<1x8x1xi32> to vector<8x1xi32>
    %c0_i32 = arith.constant 0 : i32
    %8 = vector.broadcast %c0_i32 : i32 to vector<8x1xi32>
    %9 = arith.cmpi ne, %7, %8 : vector<8x1xi32>
    %c0_11 = arith.constant 0 : index
    %c0_12 = arith.constant 0 : index
    %c0_13 = arith.constant 0 : index
    %10 = vector.load %arg5[%c0_11, %c0_12, %c0_13] : memref<1x1x8xi32, #tpu.memory_space<vmem>>, vector<1x1x8xi32>
    %11 = vector.shape_cast %10 : vector<1x1x8xi32> to vector<1x8xi32>
    %c0_i32_14 = arith.constant 0 : i32
    %12 = vector.broadcast %c0_i32_14 : i32 to vector<1x8xi32>
    %13 = arith.cmpi ne, %11, %12 : vector<1x8xi32>
    %14 = vector.broadcast %9 : vector<8x1xi1> to vector<8x8xi1>
    %15 = vector.broadcast %13 : vector<1x8xi1> to vector<8x8xi1>
    %16 = arith.andi %14, %15 : vector<8x8xi1>
    %17 = vector.extract_strided_slice %1 {offsets = [0, 0], sizes = [8, 8], strides = [1, 1]} : vector<8x32xbf16> to vector<8x8xbf16>
    %18 = vector.extract_strided_slice %3 {offsets = [0, 0], sizes = [8, 8], strides = [1, 1]} : vector<8x32xbf16> to vector<8x8xbf16>
    %19 = vector.extract_strided_slice %5 {offsets = [0, 0], sizes = [8, 8], strides = [1, 1]} : vector<8x32xbf16> to vector<8x8xbf16>
    %cst = arith.constant dense<0.000000e+00> : vector<8x8xf32>
    %20 = tpu.matmul %17, %18, %cst {dimension_numbers = #tpu.dot_dimension_numbers<[1], [1], [0], [0], [0, 0, 1, 0], [], []>} : vector<8x8xbf16>, vector<8x8xbf16>, vector<8x8xf32> -> vector<8x8xf32>
    %cst_15 = arith.constant 0.353553385 : f32
    %21 = vector.broadcast %cst_15 : f32 to vector<8x8xf32>
    %22 = arith.mulf %20, %21 : vector<8x8xf32>
    %cst_16 = arith.constant -1.000000e+04 : f32
    %23 = vector.broadcast %cst_16 : f32 to vector<8x8xf32>
    %24 = arith.select %16, %22, %23 : vector<8x8xi1>, vector<8x8xf32>
    %cst_17 = arith.constant dense<0xFF800000> : vector<8xf32>
    %25 = vector.multi_reduction <maximumf>, %24, %cst_17 [1] : vector<8x8xf32> to vector<8xf32>
    %26 = vector.shape_cast %25 : vector<8xf32> to vector<8x1xf32>
    %27 = vector.broadcast %26 : vector<8x1xf32> to vector<8x8xf32>
    %28 = arith.subf %24, %27 : vector<8x8xf32>
    %29 = math.exp %28 : vector<8x8xf32>
    %cst_18 = arith.constant dense<0.000000e+00> : vector<8xf32>
    %30 = vector.multi_reduction <add>, %29, %cst_18 [1] : vector<8x8xf32> to vector<8xf32>
    %31 = vector.shape_cast %30 : vector<8xf32> to vector<8x1xf32>
    %32 = tpu.reciprocal %31 {approx = true} : vector<8x1xf32> -> vector<8x1xf32>
    %33 = vector.broadcast %32 : vector<8x1xf32> to vector<8x8xf32>
    %34 = arith.mulf %29, %33 : vector<8x8xf32>
    %35 = arith.truncf %34 : vector<8x8xf32> to vector<8x8xbf16>
    %cst_19 = arith.constant dense<0.000000e+00> : vector<8x8xf32>
    %36 = tpu.matmul %35, %19, %cst_19 {dimension_numbers = #tpu.dot_dimension_numbers<[1], [0], [0], [1], [0, 0, 1, 1], [], []>} : vector<8x8xbf16>, vector<8x8xbf16>, vector<8x8xf32> -> vector<8x8xf32>
    %37 = vector.extract_strided_slice %1 {offsets = [0, 8], sizes = [8, 8], strides = [1, 1]} : vector<8x32xbf16> to vector<8x8xbf16>
    %38 = vector.extract_strided_slice %3 {offsets = [0, 8], sizes = [8, 8], strides = [1, 1]} : vector<8x32xbf16> to vector<8x8xbf16>
    %39 = vector.extract_strided_slice %5 {offsets = [0, 8], sizes = [8, 8], strides = [1, 1]} : vector<8x32xbf16> to vector<8x8xbf16>
    %cst_20 = arith.constant dense<0.000000e+00> : vector<8x8xf32>
    %40 = tpu.matmul %37, %38, %cst_20 {dimension_numbers = #tpu.dot_dimension_numbers<[1], [1], [0], [0], [0, 0, 1, 0], [], []>} : vector<8x8xbf16>, vector<8x8xbf16>, vector<8x8xf32> -> vector<8x8xf32>
    %cst_21 = arith.constant 0.353553385 : f32
    %41 = vector.broadcast %cst_21 : f32 to vector<8x8xf32>
    %42 = arith.mulf %40, %41 : vector<8x8xf32>
    %cst_22 = arith.constant -1.000000e+04 : f32
    %43 = vector.broadcast %cst_22 : f32 to vector<8x8xf32>
    %44 = arith.select %16, %42, %43 : vector<8x8xi1>, vector<8x8xf32>
    %cst_23 = arith.constant dense<0xFF800000> : vector<8xf32>
    %45 = vector.multi_reduction <maximumf>, %44, %cst_23 [1] : vector<8x8xf32> to vector<8xf32>
    %46 = vector.shape_cast %45 : vector<8xf32> to vector<8x1xf32>
    %47 = vector.broadcast %46 : vector<8x1xf32> to vector<8x8xf32>
    %48 = arith.subf %44, %47 : vector<8x8xf32>
    %49 = math.exp %48 : vector<8x8xf32>
    %cst_24 = arith.constant dense<0.000000e+00> : vector<8xf32>
    %50 = vector.multi_reduction <add>, %49, %cst_24 [1] : vector<8x8xf32> to vector<8xf32>
    %51 = vector.shape_cast %50 : vector<8xf32> to vector<8x1xf32>
    %52 = tpu.reciprocal %51 {approx = true} : vector<8x1xf32> -> vector<8x1xf32>
    %53 = vector.broadcast %52 : vector<8x1xf32> to vector<8x8xf32>
    %54 = arith.mulf %49, %53 : vector<8x8xf32>
    %55 = arith.truncf %54 : vector<8x8xf32> to vector<8x8xbf16>
    %cst_25 = arith.constant dense<0.000000e+00> : vector<8x8xf32>
    %56 = tpu.matmul %55, %39, %cst_25 {dimension_numbers = #tpu.dot_dimension_numbers<[1], [0], [0], [1], [0, 0, 1, 1], [], []>} : vector<8x8xbf16>, vector<8x8xbf16>, vector<8x8xf32> -> vector<8x8xf32>
    %57 = vector.extract_strided_slice %1 {offsets = [0, 16], sizes = [8, 8], strides = [1, 1]} : vector<8x32xbf16> to vector<8x8xbf16>
    %58 = vector.extract_strided_slice %3 {offsets = [0, 16], sizes = [8, 8], strides = [1, 1]} : vector<8x32xbf16> to vector<8x8xbf16>
    %59 = vector.extract_strided_slice %5 {offsets = [0, 16], sizes = [8, 8], strides = [1, 1]} : vector<8x32xbf16> to vector<8x8xbf16>
    %cst_26 = arith.constant dense<0.000000e+00> : vector<8x8xf32>
    %60 = tpu.matmul %57, %58, %cst_26 {dimension_numbers = #tpu.dot_dimension_numbers<[1], [1], [0], [0], [0, 0, 1, 0], [], []>} : vector<8x8xbf16>, vector<8x8xbf16>, vector<8x8xf32> -> vector<8x8xf32>
    %cst_27 = arith.constant 0.353553385 : f32
    %61 = vector.broadcast %cst_27 : f32 to vector<8x8xf32>
    %62 = arith.mulf %60, %61 : vector<8x8xf32>
    %cst_28 = arith.constant -1.000000e+04 : f32
    %63 = vector.broadcast %cst_28 : f32 to vector<8x8xf32>
    %64 = arith.select %16, %62, %63 : vector<8x8xi1>, vector<8x8xf32>
    %cst_29 = arith.constant dense<0xFF800000> : vector<8xf32>
    %65 = vector.multi_reduction <maximumf>, %64, %cst_29 [1] : vector<8x8xf32> to vector<8xf32>
    %66 = vector.shape_cast %65 : vector<8xf32> to vector<8x1xf32>
    %67 = vector.broadcast %66 : vector<8x1xf32> to vector<8x8xf32>
    %68 = arith.subf %64, %67 : vector<8x8xf32>
    %69 = math.exp %68 : vector<8x8xf32>
    %cst_30 = arith.constant dense<0.000000e+00> : vector<8xf32>
    %70 = vector.multi_reduction <add>, %69, %cst_30 [1] : vector<8x8xf32> to vector<8xf32>
    %71 = vector.shape_cast %70 : vector<8xf32> to vector<8x1xf32>
    %72 = tpu.reciprocal %71 {approx = true} : vector<8x1xf32> -> vector<8x1xf32>
    %73 = vector.broadcast %72 : vector<8x1xf32> to vector<8x8xf32>
    %74 = arith.mulf %69, %73 : vector<8x8xf32>
    %75 = arith.truncf %74 : vector<8x8xf32> to vector<8x8xbf16>
    %cst_31 = arith.constant dense<0.000000e+00> : vector<8x8xf32>
    %76 = tpu.matmul %75, %59, %cst_31 {dimension_numbers = #tpu.dot_dimension_numbers<[1], [0], [0], [1], [0, 0, 1, 1], [], []>} : vector<8x8xbf16>, vector<8x8xbf16>, vector<8x8xf32> -> vector<8x8xf32>
    %77 = vector.extract_strided_slice %1 {offsets = [0, 24], sizes = [8, 8], strides = [1, 1]} : vector<8x32xbf16> to vector<8x8xbf16>
    %78 = vector.extract_strided_slice %3 {offsets = [0, 24], sizes = [8, 8], strides = [1, 1]} : vector<8x32xbf16> to vector<8x8xbf16>
    %79 = vector.extract_strided_slice %5 {offsets = [0, 24], sizes = [8, 8], strides = [1, 1]} : vector<8x32xbf16> to vector<8x8xbf16>
    %cst_32 = arith.constant dense<0.000000e+00> : vector<8x8xf32>
    %80 = tpu.matmul %77, %78, %cst_32 {dimension_numbers = #tpu.dot_dimension_numbers<[1], [1], [0], [0], [0, 0, 1, 0], [], []>} : vector<8x8xbf16>, vector<8x8xbf16>, vector<8x8xf32> -> vector<8x8xf32>
    %cst_33 = arith.constant 0.353553385 : f32
    %81 = vector.broadcast %cst_33 : f32 to vector<8x8xf32>
    %82 = arith.mulf %80, %81 : vector<8x8xf32>
    %cst_34 = arith.constant -1.000000e+04 : f32
    %83 = vector.broadcast %cst_34 : f32 to vector<8x8xf32>
    %84 = arith.select %16, %82, %83 : vector<8x8xi1>, vector<8x8xf32>
    %cst_35 = arith.constant dense<0xFF800000> : vector<8xf32>
    %85 = vector.multi_reduction <maximumf>, %84, %cst_35 [1] : vector<8x8xf32> to vector<8xf32>
    %86 = vector.shape_cast %85 : vector<8xf32> to vector<8x1xf32>
    %87 = vector.broadcast %86 : vector<8x1xf32> to vector<8x8xf32>
    %88 = arith.subf %84, %87 : vector<8x8xf32>
    %89 = math.exp %88 : vector<8x8xf32>
    %cst_36 = arith.constant dense<0.000000e+00> : vector<8xf32>
    %90 = vector.multi_reduction <add>, %89, %cst_36 [1] : vector<8x8xf32> to vector<8xf32>
    %91 = vector.shape_cast %90 : vector<8xf32> to vector<8x1xf32>
    %92 = tpu.reciprocal %91 {approx = true} : vector<8x1xf32> -> vector<8x1xf32>
    %93 = vector.broadcast %92 : vector<8x1xf32> to vector<8x8xf32>
    %94 = arith.mulf %89, %93 : vector<8x8xf32>
    %95 = arith.truncf %94 : vector<8x8xf32> to vector<8x8xbf16>
    %cst_37 = arith.constant dense<0.000000e+00> : vector<8x8xf32>
    %96 = tpu.matmul %95, %79, %cst_37 {dimension_numbers = #tpu.dot_dimension_numbers<[1], [0], [0], [1], [0, 0, 1, 1], [], []>} : vector<8x8xbf16>, vector<8x8xbf16>, vector<8x8xf32> -> vector<8x8xf32>
    %97 = tpu.concatenate %36, %56, %76, %96 in 1 : vector<8x8xf32>, vector<8x8xf32>, vector<8x8xf32>, vector<8x8xf32> -> vector<8x32xf32>
    %c0_38 = arith.constant 0 : index
    %c0_39 = arith.constant 0 : index
    %c0_40 = arith.constant 0 : index
    %98 = vector.load %arg6[%c0_38, %c0_39, %c0_40] : memref<1x8x32xf32, #tpu.memory_space<vmem>>, vector<1x8x32xf32>
    %99 = vector.shape_cast %98 : vector<1x8x32xf32> to vector<8x32xf32>
    %100 = vector.shape_cast %97 : vector<8x32xf32> to vector<1x8x32xf32>
    tpu.vector_store %arg6[%c0_38, %c0_39, %c0_40], %100 {strides = array<i32>} : memref<1x8x32xf32, #tpu.memory_space<vmem>>, vector<1x8x32xf32>,
    return
  }
  func.func @transform_0(%arg0: i32) -> (i32, i32, i32) {
    %c0_i32 = arith.constant 0 : i32
    %c0_i32_0 = arith.constant 0 : i32
    %c0_i32_1 = arith.constant 0 : i32
    return %arg0, %c0_i32, %c0_i32_0 : i32, i32, i32
  }
  func.func @transform_1(%arg0: i32) -> (i32, i32, i32) {
    %c0_i32 = arith.constant 0 : i32
    %c0_i32_0 = arith.constant 0 : i32
    %c0_i32_1 = arith.constant 0 : i32
    return %arg0, %c0_i32, %c0_i32_0 : i32, i32, i32
  }
  func.func @transform_2(%arg0: i32) -> (i32, i32, i32) {
    %c0_i32 = arith.constant 0 : i32
    %c0_i32_0 = arith.constant 0 : i32
    %c0_i32_1 = arith.constant 0 : i32
    return %arg0, %c0_i32, %c0_i32_0 : i32, i32, i32
  }
  func.func @transform_3(%arg0: i32) -> (i32, i32, i32) {
    %c0_i32 = arith.constant 0 : i32
    %c0_i32_0 = arith.constant 0 : i32
    %c0_i32_1 = arith.constant 0 : i32
    return %arg0, %c0_i32, %c0_i32_0 : i32, i32, i32
  }
  func.func @transform_4(%arg0: i32) -> (i32, i32, i32) {
    %c0_i32 = arith.constant 0 : i32
    %c0_i32_0 = arith.constant 0 : i32
    %c0_i32_1 = arith.constant 0 : i32
    return %arg0, %c0_i32, %c0_i32_0 : i32, i32, i32
  }
  func.func @transform_5(%arg0: i32) -> (i32, i32, i32) {
    %c0_i32 = arith.constant 0 : i32
    %c0_i32_0 = arith.constant 0 : i32
    %c0_i32_1 = arith.constant 0 : i32
    return %arg0, %c0_i32, %c0_i32_0 : i32, i32, i32
  }
}

module attributes {stable_mosaic.version = 11 : i64} {
  func.func @_add_ln_kernel(%arg0: i32, %arg1: memref<16x32xf32, #tpu.memory_space<vmem>>, %arg2: memref<16x32xf32, #tpu.memory_space<vmem>>, %arg3: memref<1x32xf32, #tpu.memory_space<vmem>>, %arg4: memref<1x32xf32, #tpu.memory_space<vmem>>, %arg5: memref<16x32xf32, #tpu.memory_space<vmem>>) attributes {dimension_semantics = [#tpu.dimension_semantics<parallel>], iteration_bounds = array<i64: 1>, scalar_prefetch = 0 : i64, scratch_operands = 0 : i64, tpu.core_type = #tpu.core_type<tc>, window_params = [{transform_indices = @transform_0, window_bounds = array<i64: 16, 32>}, {transform_indices = @transform_1, window_bounds = array<i64: 16, 32>}, {pipeline_mode = #tpu.pipeline_mode<synchronous>, transform_indices = @transform_2, window_bounds = array<i64: 1, 32>}, {pipeline_mode = #tpu.pipeline_mode<synchronous>, transform_indices = @transform_3, window_bounds = array<i64: 1, 32>}, {transform_indices = @transform_4, window_bounds = array<i64: 16, 32>}]} {
    %c0 = arith.constant 0 : index
    %c0_0 = arith.constant 0 : index
    %0 = vector.load %arg1[%c0, %c0_0] : memref<16x32xf32, #tpu.memory_space<vmem>>, vector<16x32xf32>
    %c0_1 = arith.constant 0 : index
    %c0_2 = arith.constant 0 : index
    %1 = vector.load %arg2[%c0_1, %c0_2] : memref<16x32xf32, #tpu.memory_space<vmem>>, vector<16x32xf32>
    %2 = arith.addf %0, %1 : vector<16x32xf32>
    %cst = arith.constant dense<0.000000e+00> : vector<16xf32>
    %3 = vector.multi_reduction <add>, %2, %cst [1] : vector<16x32xf32> to vector<16xf32>
    %4 = vector.shape_cast %3 : vector<16xf32> to vector<16x1xf32>
    %cst_3 = arith.constant 3.200000e+01 : f32
    %5 = vector.broadcast %cst_3 : f32 to vector<16x1xf32>
    %6 = arith.divf %4, %5 : vector<16x1xf32>
    %7 = vector.broadcast %6 : vector<16x1xf32> to vector<16x32xf32>
    %8 = arith.subf %2, %7 : vector<16x32xf32>
    %9 = arith.mulf %8, %8 : vector<16x32xf32>
    %cst_4 = arith.constant dense<0.000000e+00> : vector<16xf32>
    %10 = vector.multi_reduction <add>, %9, %cst_4 [1] : vector<16x32xf32> to vector<16xf32>
    %11 = vector.shape_cast %10 : vector<16xf32> to vector<16x1xf32>
    %cst_5 = arith.constant 3.200000e+01 : f32
    %12 = vector.broadcast %cst_5 : f32 to vector<16x1xf32>
    %13 = arith.divf %11, %12 : vector<16x1xf32>
    %cst_6 = arith.constant 9.99999996E-13 : f32
    %14 = vector.broadcast %cst_6 : f32 to vector<16x1xf32>
    %15 = arith.addf %13, %14 : vector<16x1xf32>
    %16 = math.rsqrt %15 : vector<16x1xf32>
    %17 = vector.broadcast %16 : vector<16x1xf32> to vector<16x32xf32>
    %18 = arith.mulf %8, %17 : vector<16x32xf32>
    %c0_7 = arith.constant 0 : index
    %c0_8 = arith.constant 0 : index
    %19 = vector.load %arg3[%c0_7, %c0_8] : memref<1x32xf32, #tpu.memory_space<vmem>>, vector<1x32xf32>
    %20 = vector.broadcast %19 : vector<1x32xf32> to vector<16x32xf32>
    %21 = arith.mulf %18, %20 : vector<16x32xf32>
    %c0_9 = arith.constant 0 : index
    %c0_10 = arith.constant 0 : index
    %22 = vector.load %arg4[%c0_9, %c0_10] : memref<1x32xf32, #tpu.memory_space<vmem>>, vector<1x32xf32>
    %23 = vector.broadcast %22 : vector<1x32xf32> to vector<16x32xf32>
    %24 = arith.addf %21, %23 : vector<16x32xf32>
    %c0_11 = arith.constant 0 : index
    %c0_12 = arith.constant 0 : index
    %25 = vector.load %arg5[%c0_11, %c0_12] : memref<16x32xf32, #tpu.memory_space<vmem>>, vector<16x32xf32>
    tpu.vector_store %arg5[%c0_11, %c0_12], %24 {strides = array<i32>} : memref<16x32xf32, #tpu.memory_space<vmem>>, vector<16x32xf32>,
    return
  }
  func.func @transform_0(%arg0: i32) -> (i32, i32) {
    %c0_i32 = arith.constant 0 : i32
    %c0_i32_0 = arith.constant 0 : i32
    return %arg0, %c0_i32 : i32, i32
  }
  func.func @transform_1(%arg0: i32) -> (i32, i32) {
    %c0_i32 = arith.constant 0 : i32
    %c0_i32_0 = arith.constant 0 : i32
    return %arg0, %c0_i32 : i32, i32
  }
  func.func @transform_2(%arg0: i32) -> (i32, i32) {
    %c0_i32 = arith.constant 0 : i32
    %c0_i32_0 = arith.constant 0 : i32
    %c0_i32_1 = arith.constant 0 : i32
    return %c0_i32, %c0_i32_0 : i32, i32
  }
  func.func @transform_3(%arg0: i32) -> (i32, i32) {
    %c0_i32 = arith.constant 0 : i32
    %c0_i32_0 = arith.constant 0 : i32
    %c0_i32_1 = arith.constant 0 : i32
    return %c0_i32, %c0_i32_0 : i32, i32
  }
  func.func @transform_4(%arg0: i32) -> (i32, i32) {
    %c0_i32 = arith.constant 0 : i32
    %c0_i32_0 = arith.constant 0 : i32
    return %arg0, %c0_i32 : i32, i32
  }
}

module attributes {stable_mosaic.version = 11 : i64} {
  func.func @_linear_kernel(%arg0: i32, %arg1: i32, %arg2: i32, %arg3: memref<16x128xbf16, #tpu.memory_space<vmem>>, %arg4: memref<128x128xbf16, #tpu.memory_space<vmem>>, %arg5: memref<1x128xf32, #tpu.memory_space<vmem>>, %arg6: memref<16x128xf32, #tpu.memory_space<vmem>>, %arg7: memref<16x128xf32, #tpu.memory_space<vmem>>) attributes {dimension_semantics = [#tpu.dimension_semantics<parallel>, #tpu.dimension_semantics<parallel>, #tpu.dimension_semantics<arbitrary>], iteration_bounds = array<i64: 1, 1, 1>, scalar_prefetch = 0 : i64, scratch_operands = 1 : i64, tpu.core_type = #tpu.core_type<tc>, window_params = [{transform_indices = @transform_0, window_bounds = array<i64: 16, 128>}, {transform_indices = @transform_1, window_bounds = array<i64: 128, 128>}, {transform_indices = @transform_2, window_bounds = array<i64: 1, 128>}, {transform_indices = @transform_3, window_bounds = array<i64: 16, 128>}]} {
    %c0_i32 = arith.constant 0 : i32
    %0 = arith.cmpi eq, %arg2, %c0_i32 : i32
    %1 = arith.extui %0 : i1 to i32
    %c0_i32_0 = arith.constant 0 : i32
    %2 = arith.cmpi ne, %1, %c0_i32_0 : i32
    scf.if %2 {
      %cst_10 = arith.constant 0.000000e+00 : f32
      %12 = vector.broadcast %cst_10 : f32 to vector<16x128xf32>
      %c0_11 = arith.constant 0 : index
      %c0_12 = arith.constant 0 : index
      %13 = vector.load %arg7[%c0_11, %c0_12] : memref<16x128xf32, #tpu.memory_space<vmem>>, vector<16x128xf32>
      tpu.vector_store %arg7[%c0_11, %c0_12], %12 {strides = array<i32>} : memref<16x128xf32, #tpu.memory_space<vmem>>, vector<16x128xf32>,
    } else {
    }
    %c0 = arith.constant 0 : index
    %c0_1 = arith.constant 0 : index
    %3 = vector.load %arg7[%c0, %c0_1] : memref<16x128xf32, #tpu.memory_space<vmem>>, vector<16x128xf32>
    %c0_2 = arith.constant 0 : index
    %c0_3 = arith.constant 0 : index
    %4 = vector.load %arg3[%c0_2, %c0_3] : memref<16x128xbf16, #tpu.memory_space<vmem>>, vector<16x128xbf16>
    %c0_4 = arith.constant 0 : index
    %c0_5 = arith.constant 0 : index
    %5 = vector.load %arg4[%c0_4, %c0_5] : memref<128x128xbf16, #tpu.memory_space<vmem>>, vector<128x128xbf16>
    %cst = arith.constant dense<0.000000e+00> : vector<16x128xf32>
    %6 = tpu.matmul %4, %5, %cst {dimension_numbers = #tpu.dot_dimension_numbers<[1], [1], [0], [0], [0, 0, 1, 0], [], []>} : vector<16x128xbf16>, vector<128x128xbf16>, vector<16x128xf32> -> vector<16x128xf32>
    %7 = arith.addf %3, %6 : vector<16x128xf32>
    %c0_6 = arith.constant 0 : index
    %c0_7 = arith.constant 0 : index
    %8 = vector.load %arg7[%c0_6, %c0_7] : memref<16x128xf32, #tpu.memory_space<vmem>>, vector<16x128xf32>
    tpu.vector_store %arg7[%c0_6, %c0_7], %7 {strides = array<i32>} : memref<16x128xf32, #tpu.memory_space<vmem>>, vector<16x128xf32>,
    %c0_i32_8 = arith.constant 0 : i32
    %9 = arith.cmpi eq, %arg2, %c0_i32_8 : i32
    %10 = arith.extui %9 : i1 to i32
    %c0_i32_9 = arith.constant 0 : i32
    %11 = arith.cmpi ne, %10, %c0_i32_9 : i32
    scf.if %11 {
      %c0_10 = arith.constant 0 : index
      %c0_11 = arith.constant 0 : index
      %12 = vector.load %arg7[%c0_10, %c0_11] : memref<16x128xf32, #tpu.memory_space<vmem>>, vector<16x128xf32>
      %c0_12 = arith.constant 0 : index
      %c0_13 = arith.constant 0 : index
      %13 = vector.load %arg5[%c0_12, %c0_13] : memref<1x128xf32, #tpu.memory_space<vmem>>, vector<1x128xf32>
      %14 = vector.broadcast %13 : vector<1x128xf32> to vector<16x128xf32>
      %15 = arith.addf %12, %14 : vector<16x128xf32>
      %cst_14 = arith.constant 0.000000e+00 : f32
      %16 = vector.broadcast %cst_14 : f32 to vector<16x128xf32>
      %17 = arith.maximumf %15, %16 : vector<16x128xf32>
      %c0_15 = arith.constant 0 : index
      %c0_16 = arith.constant 0 : index
      %18 = vector.load %arg6[%c0_15, %c0_16] : memref<16x128xf32, #tpu.memory_space<vmem>>, vector<16x128xf32>
      tpu.vector_store %arg6[%c0_15, %c0_16], %17 {strides = array<i32>} : memref<16x128xf32, #tpu.memory_space<vmem>>, vector<16x128xf32>,
    } else {
    }
    return
  }
  func.func @transform_0(%arg0: i32, %arg1: i32, %arg2: i32) -> (i32, i32) {
    %c0_i32 = arith.constant 0 : i32
    return %arg0, %arg2 : i32, i32
  }
  func.func @transform_1(%arg0: i32, %arg1: i32, %arg2: i32) -> (i32, i32) {
    %c0_i32 = arith.constant 0 : i32
    return %arg1, %arg2 : i32, i32
  }
  func.func @transform_2(%arg0: i32, %arg1: i32, %arg2: i32) -> (i32, i32) {
    %c0_i32 = arith.constant 0 : i32
    %c0_i32_0 = arith.constant 0 : i32
    return %c0_i32, %arg1 : i32, i32
  }
  func.func @transform_3(%arg0: i32, %arg1: i32, %arg2: i32) -> (i32, i32) {
    %c0_i32 = arith.constant 0 : i32
    return %arg0, %arg1 : i32, i32
  }
}

module attributes {stable_mosaic.version = 11 : i64} {
  func.func @_mha_kernel(%arg0: i32, %arg1: memref<1x8x32xbf16, #tpu.memory_space<vmem>>, %arg2: memref<1x8x32xbf16, #tpu.memory_space<vmem>>, %arg3: memref<1x8x32xbf16, #tpu.memory_space<vmem>>, %arg4: memref<1x8x1xi32, #tpu.memory_space<vmem>>, %arg5: memref<1x1x8xi32, #tpu.memory_space<vmem>>, %arg6: memref<1x8x32xf32, #tpu.memory_space<vmem>>) attributes {dimension_semantics = [#tpu.dimension_semantics<parallel>], iteration_bounds = array<i64: 2>, scalar_prefetch = 0 : i64, scratch_operands = 0 : i64, tpu.core_type = #tpu.core_type<tc>, window_params = [{transform_indices = @transform_0, window_bounds = array<i64: 1, 8, 32>}, {transform_indices = @transform_1, window_bounds = array<i64: 1, 8, 32>}, {transform_indices = @transform_2, window_bounds = array<i64: 1, 8, 32>}, {transform_indices = @transform_3, window_bounds = array<i64: 1, 8, 1>}, {transform_indices = @transform_4, window_bounds = array<i64: 1, 1, 8>}, {transform_indices = @transform_5, window_bounds = array<i64: 1, 8, 32>}]} {
    %c0 = arith.constant 0 : index
    %c0_0 = arith.constant 0 : index
    %c0_1 = arith.constant 0 : index
    %0 = vector.load %arg1[%c0, %c0_0, %c0_1] : memref<1x8x32xbf16, #tpu.memory_space<vmem>>, vector<1x8x32xbf16>
    %1 = vector.shape_cast %0 : vector<1x8x32xbf16> to vector<8x32xbf16>
    %c0_2 = arith.constant 0 : index
    %c0_3 = arith.constant 0 : index
    %c0_4 = arith.constant 0 : index
    %2 = vector.load %arg2[%c0_2, %c0_3, %c0_4] : memref<1x8x32xbf16, #tpu.memory_space<vmem>>, vector<1x8x32xbf16>
    %3 = vector.shape_cast %2 : vector<1x8x32xbf16> to vector<8x32xbf16>
    %c0_5 = arith.constant 0 : index
    %c0_6 = arith.constant 0 : index
    %c0_7 = arith.constant 0 : index
    %4 = vector.load %arg3[%c0_5, %c0_6, %c0_7] : memref<1x8x32xbf16, #tpu.memory_space<vmem>>, vector<1x8x32xbf16>
    %5 = vector.shape_cast %4 : vector<1x8x32xbf16> to vector<8x32xbf16>
    %c0_8 = arith.constant 0 : index
    %c0_9 = arith.constant 0 : index
    %c0_10 = arith.constant 0 : index
    %6 = vector.load %arg4[%c0_8, %c0_9, %c0_10] : memref<1x8x1xi32, #tpu.memory_space<vmem>>, vector<1x8x1xi32>
    %7 = vector.shape_cast %6 : vector<1x8x1xi32> to vector<8x1xi32>
    %c0_i32 = arith.constant 0 : i32
    %8 = vector.broadcast %c0_i32 : i32 to vector<8x1xi32>
    %9 = arith.cmpi ne, %7, %8 : vector<8x1xi32>
    %c0_11 = arith.constant 0 : index
    %c0_12 = arith.constant 0 : index
    %c0_13 = arith.constant 0 : index
    %10 = vector.load %arg5[%c0_11, %c0_12, %c0_13] : memref<1x1x8xi32, #tpu.memory_space<vmem>>, vector<1x1x8xi32>
    %11 = vector.shape_cast %10 : vector<1x1x8xi32> to vector<1x8xi32>
    %c0_i32_14 = arith.constant 0 : i32
    %12 = vector.broadcast %c0_i32_14 : i32 to vector<1x8xi32>
    %13 = arith.cmpi ne, %11, %12 : vector<1x8xi32>
    %14 = vector.broadcast %9 : vector<8x1xi1> to vector<8x8xi1>
    %15 = vector.broadcast %13 : vector<1x8xi1> to vector<8x8xi1>
    %16 = arith.andi %14, %15 : vector<8x8xi1>
    %17 = tpu.iota {dimensions = array<i32: 0>} : vector<8x8xi32>
    %18 = tpu.iota {dimensions = array<i32: 1>} : vector<8x8xi32>
    %19 = arith.cmpi sge, %17, %18 : vector<8x8xi32>
    %20 = arith.andi %16, %19 : vector<8x8xi1>
    %21 = vector.extract_strided_slice %1 {offsets = [0, 0], sizes = [8, 8], strides = [1, 1]} : vector<8x32xbf16> to vector<8x8xbf16>
    %22 = vector.extract_strided_slice %3 {offsets = [0, 0], sizes = [8, 8], strides = [1, 1]} : vector<8x32xbf16> to vector<8x8xbf16>
    %23 = vector.extract_strided_slice %5 {offsets = [0, 0], sizes = [8, 8], strides = [1, 1]} : vector<8x32xbf16> to vector<8x8xbf16>
    %cst = arith.constant dense<0.000000e+00> : vector<8x8xf32>
    %24 = tpu.matmul %21, %22, %cst {dimension_numbers = #tpu.dot_dimension_numbers<[1], [1], [0], [0], [0, 0, 1, 0], [], []>} : vector<8x8xbf16>, vector<8x8xbf16>, vector<8x8xf32> -> vector<8x8xf32>
    %cst_15 = arith.constant 0.353553385 : f32
    %25 = vector.broadcast %cst_15 : f32 to vector<8x8xf32>
    %26 = arith.mulf %24, %25 : vector<8x8xf32>
    %cst_16 = arith.constant -1.000000e+04 : f32
    %27 = vector.broadcast %cst_16 : f32 to vector<8x8xf32>
    %28 = arith.select %20, %26, %27 : vector<8x8xi1>, vector<8x8xf32>
    %cst_17 = arith.constant dense<0xFF800000> : vector<8xf32>
    %29 = vector.multi_reduction <maximumf>, %28, %cst_17 [1] : vector<8x8xf32> to vector<8xf32>
    %30 = vector.shape_cast %29 : vector<8xf32> to vector<8x1xf32>
    %31 = vector.broadcast %30 : vector<8x1xf32> to vector<8x8xf32>
    %32 = arith.subf %28, %31 : vector<8x8xf32>
    %33 = math.exp %32 : vector<8x8xf32>
    %cst_18 = arith.constant dense<0.000000e+00> : vector<8xf32>
    %34 = vector.multi_reduction <add>, %33, %cst_18 [1] : vector<8x8xf32> to vector<8xf32>
    %35 = vector.shape_cast %34 : vector<8xf32> to vector<8x1xf32>
    %36 = tpu.reciprocal %35 {approx = true} : vector<8x1xf32> -> vector<8x1xf32>
    %37 = vector.broadcast %36 : vector<8x1xf32> to vector<8x8xf32>
    %38 = arith.mulf %33, %37 : vector<8x8xf32>
    %39 = arith.truncf %38 : vector<8x8xf32> to vector<8x8xbf16>
    %cst_19 = arith.constant dense<0.000000e+00> : vector<8x8xf32>
    %40 = tpu.matmul %39, %23, %cst_19 {dimension_numbers = #tpu.dot_dimension_numbers<[1], [0], [0], [1], [0, 0, 1, 1], [], []>} : vector<8x8xbf16>, vector<8x8xbf16>, vector<8x8xf32> -> vector<8x8xf32>
    %41 = vector.extract_strided_slice %1 {offsets = [0, 8], sizes = [8, 8], strides = [1, 1]} : vector<8x32xbf16> to vector<8x8xbf16>
    %42 = vector.extract_strided_slice %3 {offsets = [0, 8], sizes = [8, 8], strides = [1, 1]} : vector<8x32xbf16> to vector<8x8xbf16>
    %43 = vector.extract_strided_slice %5 {offsets = [0, 8], sizes = [8, 8], strides = [1, 1]} : vector<8x32xbf16> to vector<8x8xbf16>
    %cst_20 = arith.constant dense<0.000000e+00> : vector<8x8xf32>
    %44 = tpu.matmul %41, %42, %cst_20 {dimension_numbers = #tpu.dot_dimension_numbers<[1], [1], [0], [0], [0, 0, 1, 0], [], []>} : vector<8x8xbf16>, vector<8x8xbf16>, vector<8x8xf32> -> vector<8x8xf32>
    %cst_21 = arith.constant 0.353553385 : f32
    %45 = vector.broadcast %cst_21 : f32 to vector<8x8xf32>
    %46 = arith.mulf %44, %45 : vector<8x8xf32>
    %cst_22 = arith.constant -1.000000e+04 : f32
    %47 = vector.broadcast %cst_22 : f32 to vector<8x8xf32>
    %48 = arith.select %20, %46, %47 : vector<8x8xi1>, vector<8x8xf32>
    %cst_23 = arith.constant dense<0xFF800000> : vector<8xf32>
    %49 = vector.multi_reduction <maximumf>, %48, %cst_23 [1] : vector<8x8xf32> to vector<8xf32>
    %50 = vector.shape_cast %49 : vector<8xf32> to vector<8x1xf32>
    %51 = vector.broadcast %50 : vector<8x1xf32> to vector<8x8xf32>
    %52 = arith.subf %48, %51 : vector<8x8xf32>
    %53 = math.exp %52 : vector<8x8xf32>
    %cst_24 = arith.constant dense<0.000000e+00> : vector<8xf32>
    %54 = vector.multi_reduction <add>, %53, %cst_24 [1] : vector<8x8xf32> to vector<8xf32>
    %55 = vector.shape_cast %54 : vector<8xf32> to vector<8x1xf32>
    %56 = tpu.reciprocal %55 {approx = true} : vector<8x1xf32> -> vector<8x1xf32>
    %57 = vector.broadcast %56 : vector<8x1xf32> to vector<8x8xf32>
    %58 = arith.mulf %53, %57 : vector<8x8xf32>
    %59 = arith.truncf %58 : vector<8x8xf32> to vector<8x8xbf16>
    %cst_25 = arith.constant dense<0.000000e+00> : vector<8x8xf32>
    %60 = tpu.matmul %59, %43, %cst_25 {dimension_numbers = #tpu.dot_dimension_numbers<[1], [0], [0], [1], [0, 0, 1, 1], [], []>} : vector<8x8xbf16>, vector<8x8xbf16>, vector<8x8xf32> -> vector<8x8xf32>
    %61 = vector.extract_strided_slice %1 {offsets = [0, 16], sizes = [8, 8], strides = [1, 1]} : vector<8x32xbf16> to vector<8x8xbf16>
    %62 = vector.extract_strided_slice %3 {offsets = [0, 16], sizes = [8, 8], strides = [1, 1]} : vector<8x32xbf16> to vector<8x8xbf16>
    %63 = vector.extract_strided_slice %5 {offsets = [0, 16], sizes = [8, 8], strides = [1, 1]} : vector<8x32xbf16> to vector<8x8xbf16>
    %cst_26 = arith.constant dense<0.000000e+00> : vector<8x8xf32>
    %64 = tpu.matmul %61, %62, %cst_26 {dimension_numbers = #tpu.dot_dimension_numbers<[1], [1], [0], [0], [0, 0, 1, 0], [], []>} : vector<8x8xbf16>, vector<8x8xbf16>, vector<8x8xf32> -> vector<8x8xf32>
    %cst_27 = arith.constant 0.353553385 : f32
    %65 = vector.broadcast %cst_27 : f32 to vector<8x8xf32>
    %66 = arith.mulf %64, %65 : vector<8x8xf32>
    %cst_28 = arith.constant -1.000000e+04 : f32
    %67 = vector.broadcast %cst_28 : f32 to vector<8x8xf32>
    %68 = arith.select %20, %66, %67 : vector<8x8xi1>, vector<8x8xf32>
    %cst_29 = arith.constant dense<0xFF800000> : vector<8xf32>
    %69 = vector.multi_reduction <maximumf>, %68, %cst_29 [1] : vector<8x8xf32> to vector<8xf32>
    %70 = vector.shape_cast %69 : vector<8xf32> to vector<8x1xf32>
    %71 = vector.broadcast %70 : vector<8x1xf32> to vector<8x8xf32>
    %72 = arith.subf %68, %71 : vector<8x8xf32>
    %73 = math.exp %72 : vector<8x8xf32>
    %cst_30 = arith.constant dense<0.000000e+00> : vector<8xf32>
    %74 = vector.multi_reduction <add>, %73, %cst_30 [1] : vector<8x8xf32> to vector<8xf32>
    %75 = vector.shape_cast %74 : vector<8xf32> to vector<8x1xf32>
    %76 = tpu.reciprocal %75 {approx = true} : vector<8x1xf32> -> vector<8x1xf32>
    %77 = vector.broadcast %76 : vector<8x1xf32> to vector<8x8xf32>
    %78 = arith.mulf %73, %77 : vector<8x8xf32>
    %79 = arith.truncf %78 : vector<8x8xf32> to vector<8x8xbf16>
    %cst_31 = arith.constant dense<0.000000e+00> : vector<8x8xf32>
    %80 = tpu.matmul %79, %63, %cst_31 {dimension_numbers = #tpu.dot_dimension_numbers<[1], [0], [0], [1], [0, 0, 1, 1], [], []>} : vector<8x8xbf16>, vector<8x8xbf16>, vector<8x8xf32> -> vector<8x8xf32>
    %81 = vector.extract_strided_slice %1 {offsets = [0, 24], sizes = [8, 8], strides = [1, 1]} : vector<8x32xbf16> to vector<8x8xbf16>
    %82 = vector.extract_strided_slice %3 {offsets = [0, 24], sizes = [8, 8], strides = [1, 1]} : vector<8x32xbf16> to vector<8x8xbf16>
    %83 = vector.extract_strided_slice %5 {offsets = [0, 24], sizes = [8, 8], strides = [1, 1]} : vector<8x32xbf16> to vector<8x8xbf16>
    %cst_32 = arith.constant dense<0.000000e+00> : vector<8x8xf32>
    %84 = tpu.matmul %81, %82, %cst_32 {dimension_numbers = #tpu.dot_dimension_numbers<[1], [1], [0], [0], [0, 0, 1, 0], [], []>} : vector<8x8xbf16>, vector<8x8xbf16>, vector<8x8xf32> -> vector<8x8xf32>
    %cst_33 = arith.constant 0.353553385 : f32
    %85 = vector.broadcast %cst_33 : f32 to vector<8x8xf32>
    %86 = arith.mulf %84, %85 : vector<8x8xf32>
    %cst_34 = arith.constant -1.000000e+04 : f32
    %87 = vector.broadcast %cst_34 : f32 to vector<8x8xf32>
    %88 = arith.select %20, %86, %87 : vector<8x8xi1>, vector<8x8xf32>
    %cst_35 = arith.constant dense<0xFF800000> : vector<8xf32>
    %89 = vector.multi_reduction <maximumf>, %88, %cst_35 [1] : vector<8x8xf32> to vector<8xf32>
    %90 = vector.shape_cast %89 : vector<8xf32> to vector<8x1xf32>
    %91 = vector.broadcast %90 : vector<8x1xf32> to vector<8x8xf32>
    %92 = arith.subf %88, %91 : vector<8x8xf32>
    %93 = math.exp %92 : vector<8x8xf32>
    %cst_36 = arith.constant dense<0.000000e+00> : vector<8xf32>
    %94 = vector.multi_reduction <add>, %93, %cst_36 [1] : vector<8x8xf32> to vector<8xf32>
    %95 = vector.shape_cast %94 : vector<8xf32> to vector<8x1xf32>
    %96 = tpu.reciprocal %95 {approx = true} : vector<8x1xf32> -> vector<8x1xf32>
    %97 = vector.broadcast %96 : vector<8x1xf32> to vector<8x8xf32>
    %98 = arith.mulf %93, %97 : vector<8x8xf32>
    %99 = arith.truncf %98 : vector<8x8xf32> to vector<8x8xbf16>
    %cst_37 = arith.constant dense<0.000000e+00> : vector<8x8xf32>
    %100 = tpu.matmul %99, %83, %cst_37 {dimension_numbers = #tpu.dot_dimension_numbers<[1], [0], [0], [1], [0, 0, 1, 1], [], []>} : vector<8x8xbf16>, vector<8x8xbf16>, vector<8x8xf32> -> vector<8x8xf32>
    %101 = tpu.concatenate %40, %60, %80, %100 in 1 : vector<8x8xf32>, vector<8x8xf32>, vector<8x8xf32>, vector<8x8xf32> -> vector<8x32xf32>
    %c0_38 = arith.constant 0 : index
    %c0_39 = arith.constant 0 : index
    %c0_40 = arith.constant 0 : index
    %102 = vector.load %arg6[%c0_38, %c0_39, %c0_40] : memref<1x8x32xf32, #tpu.memory_space<vmem>>, vector<1x8x32xf32>
    %103 = vector.shape_cast %102 : vector<1x8x32xf32> to vector<8x32xf32>
    %104 = vector.shape_cast %101 : vector<8x32xf32> to vector<1x8x32xf32>
    tpu.vector_store %arg6[%c0_38, %c0_39, %c0_40], %104 {strides = array<i32>} : memref<1x8x32xf32, #tpu.memory_space<vmem>>, vector<1x8x32xf32>,
    return
  }
  func.func @transform_0(%arg0: i32) -> (i32, i32, i32) {
    %c0_i32 = arith.constant 0 : i32
    %c0_i32_0 = arith.constant 0 : i32
    %c0_i32_1 = arith.constant 0 : i32
    return %arg0, %c0_i32, %c0_i32_0 : i32, i32, i32
  }
  func.func @transform_1(%arg0: i32) -> (i32, i32, i32) {
    %c0_i32 = arith.constant 0 : i32
    %c0_i32_0 = arith.constant 0 : i32
    %c0_i32_1 = arith.constant 0 : i32
    return %arg0, %c0_i32, %c0_i32_0 : i32, i32, i32
  }
  func.func @transform_2(%arg0: i32) -> (i32, i32, i32) {
    %c0_i32 = arith.constant 0 : i32
    %c0_i32_0 = arith.constant 0 : i32
    %c0_i32_1 = arith.constant 0 : i32
    return %arg0, %c0_i32, %c0_i32_0 : i32, i32, i32
  }
  func.func @transform_3(%arg0: i32) -> (i32, i32, i32) {
    %c0_i32 = arith.constant 0 : i32
    %c0_i32_0 = arith.constant 0 : i32
    %c0_i32_1 = arith.constant 0 : i32
    return %arg0, %c0_i32, %c0_i32_0 : i32, i32, i32
  }
  func.func @transform_4(%arg0: i32) -> (i32, i32, i32) {
    %c0_i32 = arith.constant 0 : i32
    %c0_i32_0 = arith.constant 0 : i32
    %c0_i32_1 = arith.constant 0 : i32
    return %arg0, %c0_i32, %c0_i32_0 : i32, i32, i32
  }
  func.func @transform_5(%arg0: i32) -> (i32, i32, i32) {
    %c0_i32 = arith.constant 0 : i32
    %c0_i32_0 = arith.constant 0 : i32
    %c0_i32_1 = arith.constant 0 : i32
    return %arg0, %c0_i32, %c0_i32_0 : i32, i32, i32
  }
}

</mosaic_0001>

<bundles_post_ra>
// kernel: _lambda_.39
= control target key start
LH: loop header
LB: loop body
LE: loop exit
PB: predicated region body
PF: predicated region fallthrough
CT: control target
= control target key end

     0   :  { %8 = vsyncpa [#allocation4], 0  ;;  %s451_s0 = inlined_call_operand.hbm [shape: bf16[16,128], index: 0, kind: input, shape index: {}]   ;;  %s452_s1 = inlined_call_operand.hbm [shape: bf16[128,128], index: 1, kind: input, shape index: {}]   ;;  %s453_s2 = inlined_call_operand.hbm [shape: f32[1,128], index: 2, kind: input, shape index: {}]   ;;  %s454_s3 = inlined_call_operand.hbm [shape: f32[16,128], index: 3, kind: output, shape index: {}]  }
   0x1   :  { %9 = vsyncpa [#allocation7], 0 }
   0x2   :  { %10 = vsyncpa [#allocation5], 0  ;;  %s366_s12 = smov [#allocation6]   ;;  %s367_s14 = smov [#allocation3]  }
   0x3   :  { %s28_s13 = sshll.u32 %s366_s12, 4  ;;  %s16_s15 = sshll.u32 %s367_s14, 4  ;;  %s29_s13 = int_to_ptr.vmem [resolvable:$true] %s28_s13  ;;  %s396_s15 = int_to_ptr.vmem [resolvable:$true] %s16_s15 }
   0x4   :  { %s272_s18 = scalar_lea.hbm %s452_s1, 1024 }
   0x5   :  { %p273_p0 = scmp.ne.s32.totalorder %s452_s1, %s272_s18  ;;  %p276_p1 = scmp.lt.u32.totalorder %s272_s18, %s452_s1 }
   0x7   :  { %p278_p2 = pnand %p276_p1, %p273_p0 }
   0x9   :  { %281 = shalt.err (!%p278_p2)
}
   0xa   :  { %s282_s23 = scalar_lea.vmem %s29_s13, 1024  ;;  %p287_p4 = scmp.lt.s32.totalorder %s29_s13, %s29_s13 }
   0xb   :  { %p283_p3 = scmp.ne.s32.totalorder %s29_s13, %s282_s23  ;;  %p288_p5 = scmp.lt.s32.totalorder %s282_s23, %s282_s23 }
   0xd   :  { %p289_p6 = por %p288_p5, %p287_p4 }
   0xf   :  { %p290_p7 = pnand %p289_p6, %p283_p3 }
  0x11   :  { %293 = shalt.err (!%p290_p7)
}
  0x12   :  { %s368_s24 = smov 64   ;;  %s369_s25 = smov 4  }
  0x13   :  { %34 = dma.hbm_to_vmem [thread:$0]  %s452_s1, 1024, %s29_s13, [#allocation7], %s368_s24, %s368_s24, %s369_s25  }
  0x14   :  { %s294_s30 = scalar_lea.hbm %s451_s0, 128 }
  0x15   :  { %p295_p8 = scmp.ne.s32.totalorder %s451_s0, %s294_s30  ;;  %p298_p9 = scmp.lt.u32.totalorder %s294_s30, %s451_s0 }
  0x17   :  { %p300_p10 = pnand %p298_p9, %p295_p8 }
  0x19   :  { %303 = shalt.err (!%p300_p10)
}
  0x1a   :  { %s304_s8 = scalar_lea.vmem %s396_s15, 128  ;;  %p309_p12 = scmp.lt.s32.totalorder %s396_s15, %s396_s15 }
  0x1b   :  { %p305_p11 = scmp.ne.s32.totalorder %s396_s15, %s304_s8  ;;  %p310_p13 = scmp.lt.s32.totalorder %s304_s8, %s304_s8 }
  0x1d   :  { %p311_p0 = por %p310_p13, %p309_p12 }
  0x1f   :  { %p312_p1 = pnand %p311_p0, %p305_p11 }
  0x21   :  { %315 = shalt.err (!%p312_p1)
}
  0x22   :  { %22 = dma.hbm_to_vmem [thread:$0]  %s451_s0, 128, %s396_s15, [#allocation4], %s368_s24, %s368_s24, %s369_s25  }
  0x23   :  { %s370_s10 = smov [#allocation8]   ;;  %s316_s14 = scalar_lea.hbm %s453_s2, 16 }
  0x24   :  { %s41_s11 = sshll.u32 %s370_s10, 4  ;;  %p317_p2 = scmp.ne.s32.totalorder %s453_s2, %s316_s14  ;;  %s42_s11 = int_to_ptr.vmem [resolvable:$true] %s41_s11 }
  0x25   :  { %p320_p3 = scmp.lt.u32.totalorder %s316_s14, %s453_s2 }
  0x27   :  { %p322_p4 = pnand %p320_p3, %p317_p2 }
  0x29   :  { %325 = shalt.err (!%p322_p4)
}
  0x2a   :  { %s326_s20 = scalar_lea.vmem %s42_s11, 16  ;;  %s330_s0 = scalar_lea.vmem %s42_s11, 32 }
  0x2b   :  { %p327_p5 = scmp.ne.s32.totalorder %s42_s11, %s326_s20  ;;  %p331_p6 = scmp.lt.s32.totalorder %s42_s11, %s42_s11 }
  0x2c   :  { %p332_p7 = scmp.lt.s32.totalorder %s330_s0, %s326_s20 }
  0x2e   :  { %p333_p8 = por %p332_p7, %p331_p6 }
  0x30   :  { %p334_p9 = pnand %p333_p8, %p327_p5 }
  0x32   :  { %337 = shalt.err (!%p334_p9)
}
  0x33   :  { %44 = dma.hbm_to_vmem [thread:$0]  %s453_s2, 16, %s42_s11, [#allocation7]  }
  0x34   :  { %360 = dma.done.wait [#allocation4], 128  }
  0x35   :  { %361 = vsyncadd [#allocation4], 4294967168 }
  0x36   :  { %362 = dma.done.wait [#allocation7], 1040  }
  0x37   :  { %363 = vsyncadd [#allocation7], 4294966256  ;;  %v371_v0 = vmov 0.0   ;;  %vm372_vm0 = vmmov 0   ;;  %v263_v1 = vld [vmem:[#allocation6] sm:$0xff]   ;;  %v264_v2 = vld [vmem:[#allocation6 + $0x8] sm:$0xff]  }
  0x38   :  { %233 = vmatprep.subr.bf16.mxu0 %v371_v0  ;;  %249 = vmatprep.mubr.msk.bf16.mxu0 %vm372_vm0, %v371_v0  ;;  %v265_v3 = vld [vmem:[#allocation6 + $0x10] sm:$0xff]   ;;  %v266_v4 = vld [vmem:[#allocation6 + $0x18] sm:$0xff]   ;;  %v267_v5 = vld [vmem:[#allocation6 + $0x20] sm:$0xff]   ;;  %s373_s2 = smov [#allocation9]  }
  0x39   :  { %234 = vmatpush3.bf16.xpose.msra.mxu0 %v263_v1  ;;  %v268_v6 = vld [vmem:[#allocation6 + $0x28] sm:$0xff]   ;;  %v269_v7 = vld [vmem:[#allocation6 + $0x30] sm:$0xff]   ;;  %v270_v8 = vld [vmem:[#allocation6 + $0x38] sm:$0xff]   ;;  %s201_s22 = sshll.u32 %s373_s2, 4  ;;  %s202_s22 = int_to_ptr.vmem [resolvable:$true] %s201_s22 }
  0x3a   :  { %235 = vmatprep.subr.bf16.mxu0 %v371_v0  ;;  %v271_v9 = vld [vmem:[#allocation3] sm:$0xff]   ;;  %v223_v10 = vld [vmem:[#allocation8] ss:$0 sm:$0xff]  ;;  %s338_s23 = scalar_lea.vmem %s202_s22, 256  ;;  %p343_p11 = scmp.lt.s32.totalorder %s202_s22, %s202_s22 }
  0x3b   :  { %p339_p10 = scmp.ne.s32.totalorder %s202_s22, %s338_s23  ;;  %p344_p12 = scmp.lt.s32.totalorder %s338_s23, %s338_s23 }
  0x3d   :  { %p345_p13 = por %p344_p12, %p343_p11 }
  0x3f   :  { %p346_p0 = pnand %p345_p13, %p339_p10 }
  0x41   :  { %236 = vmatpush3.bf16.xpose.msra.mxu0 %v264_v2 }
  0x42   :  { %237 = vmatprep.subr.bf16.mxu0 %v371_v0 }
  0x49   :  { %238 = vmatpush3.bf16.xpose.msra.mxu0 %v265_v3 }
  0x4a   :  { %239 = vmatprep.subr.bf16.mxu0 %v371_v0 }
  0x51   :  { %240 = vmatpush3.bf16.xpose.msra.mxu0 %v266_v4 }
  0x52   :  { %241 = vmatprep.subr.bf16.mxu0 %v371_v0 }
  0x59   :  { %242 = vmatpush3.bf16.xpose.msra.mxu0 %v267_v5 }
  0x5a   :  { %243 = vmatprep.subr.bf16.mxu0 %v371_v0 }
  0x61   :  { %244 = vmatpush3.bf16.xpose.msra.mxu0 %v268_v6 }
  0x62   :  { %245 = vmatprep.subr.bf16.mxu0 %v371_v0 }
  0x69   :  { %246 = vmatpush3.bf16.xpose.msra.mxu0 %v269_v7 }
  0x6a   :  { %247 = vmatprep.subr.bf16.mxu0 %v371_v0 }
  0x71   :  { %248 = vmatpush3.bf16.xpose.msra.mxu0 %v270_v8 }
  0x78   :  { %250 = vmatmul.mubr.bf16.vlgmr.msra.gmra.mrb[0].mxu0 %v271_v9 }
 0x14b   :  { %v169_v11 = vpop.f32.mrb[0].mxu0 }
 0x14c   :  { %v192_v12 = vadd.f32 %v223_v10, %v169_v11  ;;  %v251_v13 = vpop.f32.mrb[1].mxu0 }
 0x14d   :  { %v172_v14 = vpop.f32.mrb[2].mxu0 }
 0x14e   :  { %194 = vst [vmem:[#allocation9] sm:$0xff] %v192_v12  ;;  %v193_v15 = vadd.f32 %v223_v10, %v172_v14  ;;  %v252_v16 = vpop.f32.mrb[3].mxu0 }
 0x150   :  { %195 = vst [vmem:[#allocation9 + $0x8] sm:$0xff] %v193_v15 }
 0x151   :  { %349 = shalt.err (!%p346_p0)
}
 0x152   :  { %s350_s26 = scalar_lea.hbm %s454_s3, 256 }
 0x153   :  { %p351_p1 = scmp.ne.s32.totalorder %s454_s3, %s350_s26  ;;  %p354_p2 = scmp.lt.u32.totalorder %s350_s26, %s454_s3 }
 0x155   :  { %p356_p3 = pnand %p354_p2, %p351_p1 }
 0x157   :  { %359 = shalt.err (!%p356_p3)
}
 0x158   :  { %s374_s4 = smov 128   ;;  %s375_s5 = smov 8  }
 0x159   :  { %207 = dma.vmem_to_hbm [thread:$0]  %s202_s22, 256, %s454_s3, [#allocation5], %s374_s4, %s374_s4, %s375_s5  }
 0x15a   :  { %364 = dma.done.wait [#allocation5], 256  }
 0x15b   :  { %365 = vsyncadd [#allocation5], 4294967040 }
 0x15c   :  { %211 = vsyncpa [#allocation4], 1 }
 0x15d   :  { %212 = vsyncpa [#allocation7], 1 }
 0x15e   :  { %213 = vsyncpa [#allocation5], 1 }

// kernel: _lambda_.42
= control target key start
LH: loop header
LB: loop body
LE: loop exit
PB: predicated region body
PF: predicated region fallthrough
CT: control target
= control target key end

     0   :  { %9 = vsyncpa [#allocation3], 0  ;;  %s234_s0 = inlined_call_operand.hbm [shape: f32[16,32], index: 0, kind: input, shape index: {}]   ;;  %s235_s1 = inlined_call_operand.hbm [shape: f32[16,32], index: 1, kind: input, shape index: {}]   ;;  %s236_s2 = inlined_call_operand.vmem [shape: f32[1,32], index: 2, kind: input, shape index: {}]   ;;  %s237_s3 = inlined_call_operand.vmem [shape: f32[1,32], index: 3, kind: input, shape index: {}]   ;;  %s238_s4 = inlined_call_operand.vmem [shape: f32[16,32], index: 4, kind: output, shape index: {}]  }
   0x1   :  { %10 = vsyncpa [#allocation5], 0  ;;  %s163_s15 = smov [#allocation2]   ;;  %s115_s19 = scalar_lea.hbm %s234_s0, 256 }
   0x2   :  { %s16_s16 = sshll.u32 %s163_s15, 4  ;;  %p116_p0 = scmp.ne.s32.totalorder %s234_s0, %s115_s19  ;;  %s17_s16 = int_to_ptr.vmem [resolvable:$true] %s16_s16 }
   0x3   :  { %p119_p1 = scmp.lt.u32.totalorder %s115_s19, %s234_s0 }
   0x5   :  { %p121_p2 = pnand %p119_p1, %p116_p0 }
   0x7   :  { %124 = shalt.err (!%p121_p2)
}
   0x8   :  { %s125_s24 = scalar_lea.vmem %s17_s16, 256  ;;  %p130_p4 = scmp.lt.s32.totalorder %s17_s16, %s17_s16 }
   0x9   :  { %p126_p3 = scmp.ne.s32.totalorder %s17_s16, %s125_s24  ;;  %p131_p5 = scmp.lt.s32.totalorder %s125_s24, %s125_s24 }
   0xb   :  { %p132_p6 = por %p131_p5, %p130_p4 }
   0xd   :  { %p133_p7 = pnand %p132_p6, %p126_p3 }
   0xf   :  { %136 = shalt.err (!%p133_p7)
}
  0x10   :  { %s164_s25 = smov 128   ;;  %s165_s26 = smov 8  }
  0x11   :  { %22 = dma.hbm_to_vmem [thread:$0]  %s234_s0, 256, %s17_s16, [#allocation3], %s164_s25, %s164_s25, %s165_s26  }
  0x12   :  { %s166_s29 = smov [#allocation4]   ;;  %s137_s7 = scalar_lea.hbm %s235_s1, 256 }
  0x13   :  { %s28_s30 = sshll.u32 %s166_s29, 4  ;;  %p138_p8 = scmp.ne.s32.totalorder %s235_s1, %s137_s7  ;;  %s29_s30 = int_to_ptr.vmem [resolvable:$true] %s28_s30 }
  0x14   :  { %p141_p9 = scmp.lt.u32.totalorder %s137_s7, %s235_s1 }
  0x16   :  { %p143_p10 = pnand %p141_p9, %p138_p8 }
  0x18   :  { %146 = shalt.err (!%p143_p10)
}
  0x19   :  { %s147_s12 = scalar_lea.vmem %s29_s30, 256  ;;  %p152_p12 = scmp.lt.s32.totalorder %s29_s30, %s29_s30 }
  0x1a   :  { %p148_p11 = scmp.ne.s32.totalorder %s29_s30, %s147_s12  ;;  %p153_p13 = scmp.lt.s32.totalorder %s147_s12, %s147_s12 }
  0x1c   :  { %p154_p0 = por %p153_p13, %p152_p12 }
  0x1e   :  { %p155_p1 = pnand %p154_p0, %p148_p11 }
  0x20   :  { %158 = shalt.err (!%p155_p1)
}
  0x21   :  { %34 = dma.hbm_to_vmem [thread:$0]  %s235_s1, 256, %s29_s30, [#allocation5], %s164_s25, %s164_s25, %s165_s26  }
  0x22   :  { %159 = dma.done.wait [#allocation3], 256  }
  0x23   :  { %160 = vsyncadd [#allocation3], 4294967040 }
  0x24   :  { %161 = dma.done.wait [#allocation5], 256  }
  0x25   :  { %162 = vsyncadd [#allocation5], 4294967040  ;;  %v45_v0 = vld [vmem:[#allocation2] sm:$0xff]  ;;  %v47_v1 = vld [vmem:[#allocation4] sm:$0xff]  ;;  %vm51_vm0 = vcmask 261120  }
  0x26   :  { %v46_v2 = vld [vmem:[#allocation2 + $0x8] sm:$0xff]  ;;  %v49_v3 = vadd.f32 %v47_v1, %v45_v0  ;;  %v48_v4 = vld [vmem:[#allocation4 + $0x8] sm:$0xff]  ;;  %v105_v25 = vld [vmem:[%s236_s2] ss:$0 sm:$0xff] }
  0x27   :  { %v50_v5 = vadd.f32 %v48_v4, %v46_v2  ;;  %v106_v27 = vld [vmem:[%s237_s3] ss:$0 sm:$0xff] }
  0x28   :  { %v52_v6 = vsel %vm51_vm0, %v49_v3, 0.0 }
  0x29   :  { %53 = vadd.xlane.f32.xlu0 %v52_v6  ;;  %v55_v7 = vsel %vm51_vm0, %v50_v5, 0.0 }
  0x2d   :  { %56 = vadd.xlane.f32.xlu0 %v55_v7 }
  0xb6   :  { %v54_v8 = vpop.xlane.xlu0 %53 }
  0xb7   :  { %v59_v9 = vmul.f32 0.03125, %v54_v8 }
  0xb9   :  { %v61_v10 = vsub.f32 %v49_v3, %v59_v9 }
  0xba   :  { %v57_v11 = vpop.xlane.xlu0 %56 }
  0xbb   :  { %v60_v12 = vmul.f32 0.03125, %v57_v11  ;;  %v63_v13 = vmul.f32 %v61_v10, %v61_v10 }
  0xbd   :  { %v62_v14 = vsub.f32 %v50_v5, %v60_v12  ;;  %v65_v15 = vsel %vm51_vm0, %v63_v13, 0.0 }
  0xbe   :  { %66 = vadd.xlane.f32.xlu1 %v65_v15 }
  0xbf   :  { %v64_v16 = vmul.f32 %v62_v14, %v62_v14 }
  0xc1   :  { %v68_v17 = vsel %vm51_vm0, %v64_v16, 0.0 }
  0xc2   :  { %69 = vadd.xlane.f32.xlu1 %v68_v17 }
 0x14b   :  { %v67_v18 = vpop.xlane.xlu1 %66 }
 0x14c   :  { %v71_v19 = vmul.f32 0.03125, %v67_v18 }
 0x14e   :  { %v73_v20 = vadd.f32 1e-12, %v71_v19 }
 0x14f   :  { %v70_v21 = vpop.xlane.xlu1 %69 }
 0x150   :  { %111 = vrsqrt.f32 %v73_v20  ;;  %v72_v22 = vmul.f32 0.03125, %v70_v21 }
 0x152   :  { %v74_v23 = vadd.f32 1e-12, %v72_v22 }
 0x154   :  { %113 = vrsqrt.f32 %v74_v23 }
 0x15a   :  { %v112_v24 = vpop.eup %111 }
 0x15b   :  { %v77_v26 = vmul.f32 %v112_v24, %v61_v10 }
 0x15d   :  { %v86_v28 = vmul.f32 %v105_v25, %v77_v26 }
 0x15e   :  { %v114_v29 = vpop.eup %113 }
 0x15f   :  { %v95_v30 = vadd.f32 %v106_v27, %v86_v28  ;;  %v78_v31 = vmul.f32 %v114_v29, %v62_v14 }
 0x161   :  { %97 = vst.msk [vmem:[%s238_s4] sm:$0xff] %vm51_vm0, %v95_v30  ;;  %v87_v32 = vmul.f32 %v105_v25, %v78_v31 }
 0x163   :  { %v96_v33 = vadd.f32 %v106_v27, %v87_v32 }
 0x165   :  { %98 = vst.msk [vmem:[%s238_s4 + $0x8] sm:$0xff] %vm51_vm0, %v96_v33 }
 0x166   :  { %103 = vsyncpa [#allocation3], 1 }
 0x167   :  { %104 = vsyncpa [#allocation5], 1 }

// kernel: _lambda_.40
= control target key start
LH: loop header
LB: loop body
LE: loop exit
PB: predicated region body
PF: predicated region fallthrough
CT: control target
= control target key end

     0   :  { %s1889_s0 = inlined_call_operand.hbm [shape: bf16[2,8,32], index: 0, kind: input, shape index: {}]   ;;  %s1890_s1 = inlined_call_operand.hbm [shape: bf16[2,8,32], index: 1, kind: input, shape index: {}]   ;;  %s1891_s2 = inlined_call_operand.hbm [shape: bf16[2,8,32], index: 2, kind: input, shape index: {}]   ;;  %s1892_s3 = inlined_call_operand.hbm [shape: s32[2,8,1], index: 3, kind: input, shape index: {}]   ;;  %s1893_s4 = inlined_call_operand.hbm [shape: s32[2,1,8], index: 4, kind: input, shape index: {}]   ;;  %s1894_s5 = inlined_call_operand.hbm [shape: f32[2,8,32], index: 5, kind: output, shape index: {}]  }
   0x1   :  { %1905 = sst [smem:[#allocation20_spill]] %s1890_s1 }
   0x2   :  { %1906 = sst [smem:[#allocation21_spill]] %s1892_s3 }
   0x3   :  { %10 = vsyncpa [#allocation3], 0 }
   0x4   :  { %12 = vsyncpa [#allocation3 + $0x1], 0 }
   0x5   :  { %13 = vsyncpa [#allocation6], 0 }
   0x6   :  { %15 = vsyncpa [#allocation6 + $0x1], 0 }
   0x7   :  { %16 = vsyncpa [#allocation9], 0 }
   0x8   :  { %18 = vsyncpa [#allocation9 + $0x1], 0 }
   0x9   :  { %19 = vsyncpa [#allocation4], 0 }
   0xa   :  { %21 = vsyncpa [#allocation4 + $0x1], 0  ;;  %s1501_s18 = smov 0   ;;  %s1503_s19 = smov 0  }
   0xb   :  { %s1505_s20 = smov 0   ;;  %s1507_s21 = smov 0  }
   0xc LB: > { %1907 = sst [smem:[#allocation16_spill]] %s1450_s20  ;;  %s1522_s22 = sadd.s32 4294967295, %s1454_s21   ;;  %s1454_s21 = sphi %s1507_s21, %s1932_s21   ;;  %s1450_s20 = sphi %s1505_s20, %s1934_s20   ;;  %s1446_s19 = sphi %s1503_s19, %s1936_s19   ;;  %s1442_s18 = sphi %s1501_s18, %s1935_s18  }
   0xd   : > { %s1038_s23 = sadd.s32 4294967294, %s1454_s21   ;;  %s1526_s24 = sadd.s32 1, %s1454_s21  }
   0xe   : > { %1908 = sst [smem:[#allocation17_spill]] %s1526_s24  ;;  %s34_s25 = sadd.s32 1, %s1450_s20 }
   0xf   : > { %s31_s26 = ssub.s32 %s1454_s21, %s1526_s24  ;;  %p41_p0 = scmp.ne.s32.totalorder %s1450_s20, %s1446_s19 }
  0x10   : > { %p32_p1 = scmp.eq.s32.totalorder %s31_s26, 0  ;;  %p42_p2 = scmp.eq.s32.totalorder %s1454_s21, 0 }
  0x11   : > { %p47_p3 = scmp.ne.s32.totalorder %s1446_s19, %s1442_s18  ;;  %p48_p4 = scmp.eq.s32.totalorder %s1522_s22, 0 }
  0x12   : > { %s1538_s27 = scalar_select %p32_p1, %s1450_s20, %s34_s25  }
  0x13   : > { %p43_p5 = por %p42_p2, %p41_p0  ;;  %p1540_p6 = por %p48_p4, %p47_p3 }
  0x14   : > { %1909 = sst [smem:[#allocation18_spill]] %s1538_s27  ;;  %p175_p7 = scmp.eq.s32.totalorder %s1522_s22, 1 }
  0x15   : > { %s1910_s28 = scalar_select %p1540_p6, 1, 0 }
  0x16   : > { %p181_p8 = scmp.eq.s32.totalorder %s1038_s23, 1  ;;  %p1167_p10 = scmp.lt.s32.totalorder %s1454_s21, 2 }
  0x17   : > { %p1547_p11 = por %p175_p7, %p41_p0  ;;  %s1556_s6 = sand.u32 1, %s1450_s20  }
  0x18   : > { %p1551_p12 = por %p181_p8, %p47_p3  ;;  %s1559_s7 = sshll.u32 %s1454_s21, 6 }
  0x19   : > { %s1911_s29 = scalar_select %p1547_p11, 1, 0 }
  0x1a   : > { %s1912_s30 = scalar_select %p1551_p12, 1, 0 }
  0x1b   : > { %s1562_s8 = sshll.u32 %s1556_s6, 2  ;;  %p1564_p13 = pnand %p1167_p10, %p43_p5 }
  0x1c   : > { %1913 = sst [smem:[#allocation19_spill]] %s1912_s30  ;;  %s1895_s10 = sand.u32 1, %s1454_s21  }
  0x1d   : > { %s1914_s9 = scalar_select %p1564_p13, 1, 0 }
  0x1e   : > { %s1915_s1 = sld [smem:[#allocation20_spill]]  ;;  %s223_s14 = scalar_lea.vmem [#allocation5], %s1562_s8 }
  0x1f   : > { %s230_s15 = sshll.u32 %s223_s14, 4  ;;  %s1581_s16 = scalar_lea.sflag [#allocation6], %s1895_s10  ;;  %s1576_s15 = int_to_ptr.vmem [resolvable:$true] %s230_s15 }
  0x20   : > { %p1587_p2 = pneg %p1564_p13 }
  0x24   : > { %s1573_s13 = scalar_lea.hbm %s1915_s1, %s1559_s7  ;;  %s1235_s11 = scalar_lea.hbm %s1915_s1, 128 }
  0x25   : > { %s1230_s17 = scalar_lea.hbm %s1573_s13, 64  ;;  %p1236_p5 = scmp.lt.u32.totalorder %s1573_s13, %s1915_s1 }
  0x26   : > { %p1231_p1 = scmp.ne.s32.totalorder %s1573_s13, %s1230_s17  ;;  %p1237_p7 = scmp.lt.u32.totalorder %s1235_s11, %s1230_s17 }
  0x27   : > { %p1239_p10 = scmp.lt.u32.totalorder %s1230_s17, %s1573_s13 }
  0x28   : > { %p1233_p3 = pnand %p1587_p2, %p1231_p1  ;;  %p1238_p8 = por %p1237_p7, %p1236_p5 }
  0x2a   : > { %p1234_p4 = pneg %p1233_p3  ;;  %p1240_p9 = por %p1239_p10, %p1238_p8 }
  0x2c   : > { %p1241_p0 = pnand %p1240_p9, %p1234_p4 }
  0x2e   : > { %1244 = shalt.err (!%p1241_p0)
}
  0x2f   : > { %s1245_s10 = scalar_lea.vmem %s1576_s15, 64  ;;  %s1456_s25 = smov [#allocation5]  }
  0x30   : > { %p1246_p1 = scmp.ne.s32.totalorder %s1576_s15, %s1245_s10  ;;  %s1250_s26 = sshll.u32 %s1456_s25, 4  ;;  %s1251_s26 = int_to_ptr.vmem [resolvable:$false] %s1250_s26 }
  0x31   : > { %s1252_s12 = scalar_lea.vmem %s1251_s26, 128  ;;  %p1253_p11 = scmp.lt.s32.totalorder %s1576_s15, %s1251_s26 }
  0x32   : > { %p1248_p3 = pnand %p1246_p1, %p1587_p2  ;;  %p1254_p6 = scmp.lt.s32.totalorder %s1252_s12, %s1245_s10 }
  0x34   : > { %p1249_p12 = pneg %p1248_p3  ;;  %p1255_p5 = por %p1254_p6, %p1253_p11 }
  0x36   : > { %p1256_p7 = pnand %p1255_p5, %p1249_p12 }
  0x38   : > { %1259 = shalt.err (!%p1256_p7)
}
  0x39   : > { %1153 = dma.hbm_to_vmem [thread:$0]  (!%p1564_p13), %s1573_s13, 64, %s1576_s15, %s1581_s16  }
  0x3a   : > { %p288_p9 = scmp.lt.s32.totalorder %s1454_s21, 3  ;;  %s1047_s17 = sshll.u32 %s1556_s6, 3 }
  0x3b   : > { %s1048_s11 = sshll.u32 %s1454_s21, 7  ;;  %p1917_p0 = scmp.ge.s32.totalorder %s1454_s21, 1 }
  0x3c   : > { %s1919_s3 = sld [smem:[#allocation21_spill]]  ;;  %s259_s12 = scalar_lea.vmem [#allocation8], %s1047_s17 }
  0x3d   : > { %p1616_p4 = pnand %p1917_p0, %p288_p9  ;;  %s266_s1 = sshll.u32 %s259_s12, 4  ;;  %s267_s1 = int_to_ptr.vmem [resolvable:$true] %s266_s1 }
  0x3e   : > { %s1920_s13 = sand.u32 1, %s1454_s21  }
  0x3f   : > { %s1918_s10 = scalar_select %p1616_p4, 1, 0 }
  0x40   : > { %s1627_s15 = scalar_lea.sflag [#allocation9], %s1920_s13 }
  0x42   : > { %s1623_s26 = scalar_lea.hbm %s1919_s3, %s1048_s11  ;;  %s1265_s11 = scalar_lea.hbm %s1919_s3, 256 }
  0x43   : > { %s1260_s27 = scalar_lea.hbm %s1623_s26, 128  ;;  %p1266_p8 = scmp.lt.u32.totalorder %s1623_s26, %s1919_s3 }
  0x44   : > { %p1261_p6 = scmp.ne.s32.totalorder %s1623_s26, %s1260_s27  ;;  %p1267_p10 = scmp.lt.u32.totalorder %s1265_s11, %s1260_s27 }
  0x45   : > { %p1269_p3 = scmp.lt.u32.totalorder %s1260_s27, %s1623_s26 }
  0x46   : > { %p1263_p11 = pnand %p1261_p6, %p1587_p2  ;;  %p1268_p1 = por %p1267_p10, %p1266_p8 }
  0x48   : > { %p1264_p12 = pneg %p1263_p11  ;;  %p1270_p5 = por %p1269_p3, %p1268_p1 }
  0x4a   : > { %p1271_p7 = pnand %p1270_p5, %p1264_p12 }
  0x4c   : > { %1274 = shalt.err (!%p1271_p7)
}
  0x4d   : > { %s1275_s17 = scalar_lea.vmem %s267_s1, 128  ;;  %s1457_s12 = smov [#allocation8]  }
  0x4e   : > { %p1276_p9 = scmp.ne.s32.totalorder %s267_s1, %s1275_s17  ;;  %s1280_s13 = sshll.u32 %s1457_s12, 4  ;;  %s1281_s13 = int_to_ptr.vmem [resolvable:$false] %s1280_s13 }
  0x4f   : > { %s1282_s20 = scalar_lea.vmem %s1281_s13, 256  ;;  %p1283_p11 = scmp.lt.s32.totalorder %s267_s1, %s1281_s13 }
  0x50   : > { %p1278_p0 = pnand %p1276_p9, %p1587_p2  ;;  %p1284_p4 = scmp.lt.s32.totalorder %s1282_s20, %s1275_s17 }
  0x52   : > { %p1279_p6 = pneg %p1278_p0  ;;  %p1285_p13 = por %p1284_p4, %p1283_p11 }
  0x54   : > { %p1286_p8 = pnand %p1285_p13, %p1279_p6 }
  0x56   : > { %1289 = shalt.err (!%p1286_p8)
}
  0x57   : > { %p1921_p10 = scmp.ne.s32.totalorder %s1914_s9, 0  ;;  %s1651_s11 = scalar_lea.hbm %s1889_s0, %s1559_s7 }
  0x58   : > { %s205_s14 = scalar_lea.vmem [#allocation2], %s1562_s8  ;;  %s1660_s13 = scalar_lea.hbm %s1891_s2, %s1559_s7 }
  0x59   : > { %1159 = dma.hbm_to_vmem [thread:$0]  (!%p1921_p10), %s1623_s26, 128, %s267_s1, %s1627_s15  }
  0x5a   : > { %s212_s25 = sshll.u32 %s205_s14, 4  ;;  %s202_s20 = scalar_lea.sflag [#allocation3], %s1556_s6  ;;  %s1654_s25 = int_to_ptr.vmem [resolvable:$true] %s212_s25 }
  0x5b   : > { %s1290_s1 = scalar_lea.hbm %s1651_s11, 64  ;;  %s1295_s27 = scalar_lea.hbm %s1889_s0, 128 }
  0x5c   : > { %p1291_p13 = scmp.ne.s32.totalorder %s1651_s11, %s1290_s1  ;;  %p1296_p1 = scmp.lt.u32.totalorder %s1651_s11, %s1889_s0 }
  0x5d   : > { %p1297_p3 = scmp.lt.u32.totalorder %s1295_s27, %s1290_s1  ;;  %p1299_p7 = scmp.lt.u32.totalorder %s1290_s1, %s1651_s11 }
  0x5e   : > { %p1293_p4 = pnand %p1291_p13, %p1587_p2 }
  0x5f   : > { %p1298_p5 = por %p1297_p3, %p1296_p1 }
  0x60   : > { %p1294_p12 = pneg %p1293_p4 }
  0x61   : > { %p1300_p9 = por %p1299_p7, %p1298_p5 }
  0x63   : > { %p1301_p0 = pnand %p1300_p9, %p1294_p12 }
  0x65   : > { %1304 = shalt.err (!%p1301_p0)
}
  0x66   : > { %s1305_s7 = scalar_lea.vmem %s1654_s25, 64  ;;  %s1458_s14 = smov [#allocation2]  }
  0x67   : > { %p1306_p6 = scmp.ne.s32.totalorder %s1654_s25, %s1305_s7  ;;  %s1310_s17 = sshll.u32 %s1458_s14, 4  ;;  %s1311_s17 = int_to_ptr.vmem [resolvable:$false] %s1310_s17 }
  0x68   : > { %s1312_s3 = scalar_lea.vmem %s1311_s17, 128  ;;  %p1313_p13 = scmp.lt.s32.totalorder %s1654_s25, %s1311_s17 }
  0x69   : > { %p1308_p11 = pnand %p1306_p6, %p1587_p2  ;;  %p1314_p4 = scmp.lt.s32.totalorder %s1312_s3, %s1305_s7 }
  0x6b   : > { %p1309_p8 = pneg %p1308_p11  ;;  %p1315_p1 = por %p1314_p4, %p1313_p13 }
  0x6d   : > { %p1316_p3 = pnand %p1315_p1, %p1309_p8 }
  0x6f   : > { %1319 = shalt.err (!%p1316_p3)
}
  0x70   : > { %1150 = dma.hbm_to_vmem [thread:$0]  (!%p1921_p10), %s1651_s11, 64, %s1654_s25, %s202_s20  }
  0x71   : > { %s241_s30 = scalar_lea.vmem [#allocation7], %s1562_s8  ;;  %s1049_s1 = sshll.u32 %s1454_s21, 4 }
  0x72   : > { %s248_s12 = sshll.u32 %s241_s30, 4  ;;  %s1320_s26 = scalar_lea.hbm %s1660_s13, 64  ;;  %s249_s12 = int_to_ptr.vmem [resolvable:$true] %s248_s12 }
  0x73   : > { %p1321_p12 = scmp.ne.s32.totalorder %s1660_s13, %s1320_s26  ;;  %s1325_s7 = scalar_lea.hbm %s1891_s2, 128 }
  0x74   : > { %p1326_p9 = scmp.lt.u32.totalorder %s1660_s13, %s1891_s2  ;;  %p1327_p0 = scmp.lt.u32.totalorder %s1325_s7, %s1320_s26 }
  0x75   : > { %p1323_p5 = pnand %p1321_p12, %p1587_p2  ;;  %p1329_p11 = scmp.lt.u32.totalorder %s1320_s26, %s1660_s13 }
  0x76   : > { %p1328_p6 = por %p1327_p0, %p1326_p9 }
  0x77   : > { %p1324_p7 = pneg %p1323_p5 }
  0x78   : > { %p1330_p8 = por %p1329_p11, %p1328_p6 }
  0x7a   : > { %p1331_p13 = pnand %p1330_p8, %p1324_p7 }
  0x7c   : > { %1334 = shalt.err (!%p1331_p13)
}
  0x7d   : > { %s1335_s8 = scalar_lea.vmem %s249_s12, 64  ;;  %s1459_s11 = smov [#allocation7]  }
  0x7e   : > { %p1336_p4 = scmp.ne.s32.totalorder %s249_s12, %s1335_s8  ;;  %s1340_s25 = sshll.u32 %s1459_s11, 4  ;;  %s1341_s25 = int_to_ptr.vmem [resolvable:$false] %s1340_s25 }
  0x7f   : > { %s1342_s20 = scalar_lea.vmem %s1341_s25, 128  ;;  %p1343_p12 = scmp.lt.s32.totalorder %s249_s12, %s1341_s25 }
  0x80   : > { %p1338_p1 = pnand %p1336_p4, %p1587_p2  ;;  %p1344_p5 = scmp.lt.s32.totalorder %s1342_s20, %s1335_s8 }
  0x82   : > { %p1339_p3 = pneg %p1338_p1  ;;  %p1345_p10 = por %p1344_p5, %p1343_p12 }
  0x84   : > { %p1346_p0 = pnand %p1345_p10, %p1339_p3 }
  0x86   : > { %1349 = shalt.err (!%p1346_p0)
}
  0x87   : > { %p1922_p9 = scmp.ne.s32.totalorder %s1914_s9, 0  ;;  %s1707_s26 = scalar_lea.hbm %s1893_s4, %s1049_s1 }
  0x88   : > { %s276_s24 = scalar_lea.vmem [#allocation10], %s1556_s6  ;;  %s1350_s7 = scalar_lea.hbm %s1707_s26, 16 }
  0x89   : > { %1156 = dma.hbm_to_vmem [thread:$0]  (!%p1922_p9), %s1660_s13, 64, %s249_s12, %s1581_s16  }
  0x8a   : > { %s283_s27 = sshll.u32 %s276_s24, 4  ;;  %p1351_p10 = scmp.ne.s32.totalorder %s1707_s26, %s1350_s7  ;;  %s284_s27 = int_to_ptr.vmem [resolvable:$true] %s283_s27 }
  0x8b   : > { %s1355_s16 = scalar_lea.hbm %s1893_s4, 32  ;;  %p1356_p11 = scmp.lt.u32.totalorder %s1707_s26, %s1893_s4 }
  0x8c   : > { %p1353_p7 = pnand %p1351_p10, %p1587_p2  ;;  %p1357_p8 = scmp.lt.u32.totalorder %s1355_s16, %s1350_s7 }
  0x8d   : > { %p1359_p4 = scmp.lt.u32.totalorder %s1350_s7, %s1707_s26 }
  0x8e   : > { %p1354_p6 = pneg %p1353_p7  ;;  %p1358_p13 = por %p1357_p8, %p1356_p11 }
  0x90   : > { %p1360_p1 = por %p1359_p4, %p1358_p13 }
  0x92   : > { %p1361_p3 = pnand %p1360_p1, %p1354_p6 }
  0x94   : > { %1364 = shalt.err (!%p1361_p3)
}
  0x95   : > { %s1365_s6 = scalar_lea.vmem %s284_s27, 16  ;;  %s1460_s1 = smov [#allocation10]  }
  0x96   : > { %p1366_p12 = scmp.ne.s32.totalorder %s284_s27, %s1365_s6  ;;  %s1370_s8 = sshll.u32 %s1460_s1, 4  ;;  %s1371_s8 = int_to_ptr.vmem [resolvable:$false] %s1370_s8 }
  0x97   : > { %s1372_s11 = scalar_lea.vmem %s1371_s8, 32  ;;  %p1373_p10 = scmp.lt.s32.totalorder %s284_s27, %s1371_s8 }
  0x98   : > { %p1368_p5 = pnand %p1366_p12, %p1587_p2  ;;  %p1374_p7 = scmp.lt.s32.totalorder %s1372_s11, %s1365_s6 }
  0x9a   : > { %p1369_p0 = pneg %p1368_p5  ;;  %p1375_p9 = por %p1374_p7, %p1373_p10 }
  0x9c   : > { %p1376_p8 = pnand %p1375_p9, %p1369_p0 }
  0x9e   : > { %1379 = shalt.err (!%p1376_p8)
}
  0x9f   : > { %p1923_p11 = scmp.ne.s32.totalorder %s1914_s9, 0  ;;  %p1924_p6 = scmp.ne.s32.totalorder %s1918_s10, 0 }
  0xa0   : > { %s1731_s23 = sand.u32 (!%p1924_p6), 1, %s1446_s19   ;;  %p1925_p2 = scmp.ne.s32.totalorder (!%p1924_p6), %s1910_s28, 0 }
  0xa1   : > { %1162 = dma.hbm_to_vmem [thread:$0]  (!%p1923_p11), %s1707_s26, 16, %s284_s27, %s1627_s15  }
  0xa2   : > { %292 = sbr.rel (%p1924_p6) target bundleno = 1614 (0x64e), region = 40  ;;  %s1734_s25 = sshll.u32 (!%p1924_p6), %s1731_s23, 2 }
  0xa3   : > { %s295_s20 = scalar_lea.sflag (!%p1924_p6), [#allocation3], %s1731_s23  ;;  %s298_s3 = scalar_lea.vmem (!%p1924_p6), [#allocation2], %s1734_s25 }
  0xa9   : > { %1425 = dma.done.wait (%p1925_p2), %s295_s20, 64  }
  0xaa   : > { %1427 = vsyncadd (%p1925_p2), %s295_s20, 4294967232  ;;  %s303_s9 = sand.u32 1, %s1522_s22   ;;  %s307_s15 = scalar_lea.vmem [#allocation5], %s1734_s25 }
  0xab   : > { %s304_s10 = scalar_lea.sflag [#allocation6], %s303_s9 }
  0xac   : > { %1429 = dma.done.wait (%p1925_p2), %s304_s10, 128  }
  0xad   : > { %1431 = vsyncadd (%p1925_p2), %s304_s10, 4294967168  ;;  %s1054_s30 = sshll.u32 %s1731_s23, 3  ;;  %s316_s26 = scalar_lea.vmem [#allocation7], %s1734_s25 }
  0xae   : > { %s322_s24 = scalar_lea.sflag [#allocation9], %s303_s9  ;;  %s325_s27 = scalar_lea.vmem [#allocation8], %s1054_s30 }
  0xaf   : > { %1433 = dma.done.wait (%p1925_p2), %s322_s24, 144  }
  0xb0   : > { %1435 = vsyncadd (%p1925_p2), %s322_s24, 4294967152  ;;  %v1461_v0 = vmov 0.0   ;;  %vm1462_vm0 = vmmov 0   ;;  %v1463_v1 = vmov 0   ;;  %vm399_vm1 = vcmask 64512   ;;  %v383_v3 = vld [vmem:[%s325_s27] sm:$0xff] }
  0xb1   : > { %1087 = vmatprep.subr.bf16.mxu0 %v1461_v0  ;;  %1089 = vmatprep.mubr.msk.bf16.mxu0 %vm1462_vm0, %v1461_v0  ;;  %v381_v2 = vld [vmem:[%s307_s15] sm:$0xf]  ;;  %vm384_vm2 = vcmp.ne.s32.totalorder %v383_v3, 0  ;;  %v380_v6 = vld [vmem:[%s298_s3] sm:$0xf]  ;;  %s1464_s28 = smov 120   ;;  %v393_v8 = vlaneseq }
  0xb2   : > { %1210 = vset.pattern.permute.xlu0 %v1463_v1  ;;  %1093 = vmatprep.subr.bf16.mxu1 %v1461_v0  ;;  %v404_v4 = vsel %vm399_vm1, %v381_v2, 0  ;;  %v387_v5 = vsel %vm384_vm2, 1, %v1463_v1  ;;  %v1059_v7 = vcombine.low %v381_v2, %v381_v2  ;;  %s333_s7 = scalar_lea.vmem [#allocation10], %s1731_s23  ;;  %v1058_v23 = vcombine.low %v380_v6, %v380_v6  ;;  %s1465_s14 = smov 104   ;;  %v1782_v29 = vld [vmem:[%s316_s26] sm:$0xf] }
  0xb3   : > { %1095 = vmatprep.mubr.msk.bf16.mxu1 %vm1462_vm0, %v1461_v0  ;;  %1088 = vmatpush3.bf16.xpose.msra.mxu0 %v404_v4  ;;  %v385_v9 = vld [vmem:[%s333_s7] sm:$0x1]  ;;  %v394_v10 = vshrl.u32 %v393_v8, 7  ;;  %vm463_vm7 = vcmask 1043456   ;;  %s1466_s17 = smov 112   ;;  %s1467_s16 = smov 8  }
  0xb4   : > { %389 = vperm.xlu0 %1210, %v387_v5   ;;  %1105 = vmatprep.subr.bf16.mxu0 %v1461_v0  ;;  %vm386_vm3 = vcmp.ne.s32.totalorder %v385_v9, 0  ;;  %v465_v30 = vsel %vm463_vm7, %v1782_v29, 0  ;;  %s1468_s13 = smov 16   ;;  %s1469_s12 = smov 24   ;;  %vm865_vm8 = vcmask 130048   ;;  %vm867_vm9 = vcmask 195584  }
  0xb5   : > { %515 = vrot.lane.b32.xlu1 %v1059_v7, %s1464_s28  ;;  %v395_v11 = vsub.s32 0, %v394_v10  ;;  %v392_v12 = vsel %vm386_vm3, 1, %v1463_v1  ;;  %1094 = vmatpush3.bf16.msra.mxu1 %v465_v30  ;;  %s1068_s6 = sshll.u32 %s1522_s22, 7  ;;  %s378_s1 = scalar_lea.vmem [#allocation11], %s1054_s30  ;;  %vm869_vm10 = vcmask 261120  }
  0xb6   : > { %1099 = vmatprep.subr.bf16.mxu1 %v1461_v0  ;;  %s885_s8 = sshll.u32 %s378_s1, 4  ;;  %s1845_s20 = scalar_lea.hbm %s1894_s5, %s1068_s6  ;;  %s1847_s8 = int_to_ptr.vmem [resolvable:$true] %s885_s8 }
  0xb7   : > { %v396_v13 = vrot.slane %v392_v12, %v395_v11  ;;  %s872_s22 = scalar_lea.sflag [#allocation4], %s1731_s23  ;;  %s1380_s3 = scalar_lea.vmem %s1847_s8, 128 }
  0xb8   : > { %p1381_p9 = scmp.ne.s32.totalorder %s1847_s8, %s1380_s3  ;;  %p1928_p13 = scmp.ne.s32.totalorder %s1911_s29, 0 }
  0xb9   : > { %vm397_vm4 = vcmp.eq.s32.totalorder %v396_v13, 1  ;;  %s1470_s9 = smov [#allocation11]  }
  0xba   : > { %1090 = vmatmul.mubr.msk.bf16.vlgmr.msra.gmra.mrb[0].mxu0 %vm399_vm1, %v380_v6  ;;  %v1061_v6 = vcombine.low %v1782_v29, %v1782_v29  ;;  %p1382_p4 = pnand %p1381_p9, %p1928_p13  ;;  %s1384_s10 = sshll.u32 %s1470_s9, 4  ;;  %s1385_s10 = int_to_ptr.vmem [resolvable:$false] %s1384_s10 }
  0xbb   : > { %1107 = vmatprep.mubr.msk.bf16.mxu0 %vm1462_vm0, %v1461_v0  ;;  %s1386_s15 = scalar_lea.vmem %s1385_s10, 256  ;;  %p1387_p3 = scmp.lt.s32.totalorder %s1847_s8, %s1385_s10 }
  0xbc   : > { %p1383_p1 = pneg %p1382_p4  ;;  %p1388_p12 = scmp.lt.s32.totalorder %s1386_s15, %s1380_s3 }
  0xbe   : > { %p1389_p5 = por %p1388_p12, %p1387_p3 }
  0xc0   : > { %p1390_p0 = pnand %p1389_p5, %p1383_p1 }
 0x127   : > { %v516_v31 = vpop.permute.xlu1 %515 }
 0x128   : > { %v521_v38 = vsel %vm399_vm1, %v516_v31, 0 }
 0x133   : > { %v390_v14 = vpop.permute.xlu0 %389 }
 0x134   : > { %vm391_vm5 = vcmp.eq.s32.totalorder %v390_v14, 1 }
 0x135   : > { %vm1771_vm6 = vmand %vm391_vm5, %vm397_vm4 }
 0x18d   : > { %v440_v16 = vpop.f32.mrb[0].mxu0 }
 0x18e   : > { %v446_v17 = vmul.f32 0.35355338, %v440_v16  ;;  %v1091_v18 = vpop.f32.mrb[1].mxu0 }
 0x18f   : > { %v443_v19 = vpop.f32.mrb[2].mxu0 }
 0x190   : > { %v1092_v20 = vpop.f32.mrb[3].mxu0  ;;  %v447_v21 = vsel %vm1771_vm6, %v446_v17, -10000.0 }
 0x191   : > { %v448_v22 = vsel %vm399_vm1, %v447_v21, -inf }
 0x192   : > { %449 = vmax.xlane.f32.xlu0 %v448_v22 }
 0x1a8   : > { %740 = vrot.lane.b32.xlu0 %v1058_v23, %s1465_s14 }
 0x21f   : > { %v450_v24 = vpop.xlane.xlu0 %449 }
 0x220   : > { %v451_v25 = vsub.f32 %v447_v21, %v450_v24 }
 0x222   : > { %v452_v26 = vmul.f32 1.442695, %v451_v25 }
 0x223   : > { %v741_v43 = vpop.permute.xlu0 %740 }
 0x224   : > { %1214 = vpow2.f32 %v452_v26 }
 0x22e   : > { %v1215_v27 = vpop.eup %1214 }
 0x22f   : > { %v454_v28 = vsel %vm399_vm1, %v1215_v27, 0.0 }
 0x230   : > { %455 = vadd.xlane.f32.xlu1 %v454_v28 }
 0x241   : > { %510 = vrot.lane.b32.xlu1 %v1058_v23, %s1464_s28 }
 0x245   : > { %630 = vrot.lane.b32.xlu1 %v1059_v7, %s1466_s17 }
 0x249   : > { %628 = vrot.lane.b32.xlu1 %v1058_v23, %s1466_s17 }
 0x24d   : > { %742 = vrot.lane.b32.xlu1 %v1059_v7, %s1465_s14 }
 0x2bd   : > { %v456_v32 = vpop.xlane.xlu1 %455 }
 0x2be   : > { %1216 = vrcp.f32 %v456_v32 }
 0x2c1   : > { %v511_v33 = vpop.permute.xlu1 %510 }
 0x2c5   : > { %v631_v37 = vpop.permute.xlu1 %630 }
 0x2c6   : > { %v636_v40 = vsel %vm399_vm1, %v631_v37, 0 }
 0x2c8   : > { %v1217_v34 = vpop.eup %1216 }
 0x2c9   : > { %v458_v35 = vmul.f32 %v1217_v34, %v1215_v27  ;;  %v629_v39 = vpop.permute.xlu1 %628 }
 0x2cb   : > { %v459_v36 = vpack.c.bf16 %v458_v35, %v458_v35 }
 0x2cd   : > { %1096 = vmatmul.mubr.msk.bf16.vlgmr.msra.gmra.mrb[0].mxu1 %vm399_vm1, %v459_v36  ;;  %v743_v41 = vpop.permute.xlu1 %742 }
 0x2ce   : > { %1100 = vmatpush3.bf16.xpose.msra.mxu1 %v521_v38  ;;  %1101 = vmatprep.mubr.msk.bf16.mxu1 %vm1462_vm0, %v1461_v0  ;;  %v748_v42 = vsel %vm399_vm1, %v743_v41, 0 }
 0x2cf   : > { %1111 = vmatprep.subr.bf16.mxu1 %v1461_v0 }
 0x2d5   : > { %1102 = vmatmul.mubr.msk.bf16.vlgmr.msra.gmra.mrb[4].mxu1 %vm399_vm1, %v511_v33 }
 0x2d6   : > { %1112 = vmatpush3.bf16.xpose.msra.mxu1 %v636_v40  ;;  %1113 = vmatprep.mubr.msk.bf16.mxu1 %vm1462_vm0, %v1461_v0 }
 0x2d7   : > { %1123 = vmatprep.subr.bf16.mxu1 %v1461_v0 }
 0x2dd   : > { %1114 = vmatmul.mubr.msk.bf16.vlgmr.msra.gmra.mrb[8].mxu1 %vm399_vm1, %v629_v39 }
 0x2de   : > { %1124 = vmatpush3.bf16.xpose.msra.mxu1 %v748_v42  ;;  %1125 = vmatprep.mubr.msk.bf16.mxu1 %vm1462_vm0, %v1461_v0 }
 0x2e5   : > { %1126 = vmatmul.mubr.msk.bf16.vlgmr.msra.gmra.mrb[12].mxu1 %vm399_vm1, %v741_v43 }
 0x3a0   : > { %v1806_v44 = vpop.f32.mrb[0].mxu1 }
 0x3a1   : > { %v1097_v45 = vpop.f32.mrb[1].mxu1 }
 0x3a2   : > { %v504_v46 = vpop.f32.mrb[2].mxu1 }
 0x3a3   : > { %v1098_v47 = vpop.f32.mrb[3].mxu1 }
 0x3a8   : > { %v557_v48 = vpop.f32.mrb[4].mxu1 }
 0x3a9   : > { %v563_v49 = vmul.f32 0.35355338, %v557_v48  ;;  %v1103_v50 = vpop.f32.mrb[5].mxu1 }
 0x3aa   : > { %v560_v51 = vpop.f32.mrb[6].mxu1 }
 0x3ab   : > { %v1104_v52 = vpop.f32.mrb[7].mxu1  ;;  %v564_v53 = vsel %vm1771_vm6, %v563_v49, -10000.0 }
 0x3ac   : > { %v565_v54 = vsel %vm399_vm1, %v564_v53, -inf }
 0x3ad   : > { %566 = vmax.xlane.f32.xlu1 %v565_v54 }
 0x3b0   : > { %v672_v55 = vpop.f32.mrb[8].mxu1 }
 0x3b1   : > { %v678_v56 = vmul.f32 0.35355338, %v672_v55  ;;  %v1115_v57 = vpop.f32.mrb[9].mxu1 }
 0x3b2   : > { %v675_v58 = vpop.f32.mrb[10].mxu1 }
 0x3b3   : > { %v1116_v59 = vpop.f32.mrb[11].mxu1  ;;  %v679_v60 = vsel %vm1771_vm6, %v678_v56, -10000.0 }
 0x3b4   : > { %v680_v61 = vsel %vm399_vm1, %v679_v60, -inf }
 0x3b5   : > { %681 = vmax.xlane.f32.xlu0 %v680_v61 }
 0x3b8   : > { %v784_v62 = vpop.f32.mrb[12].mxu1 }
 0x3b9   : > { %v790_v63 = vmul.f32 0.35355338, %v784_v62  ;;  %v1127_v1 = vpop.f32.mrb[13].mxu1 }
 0x3ba   : > { %v787_v2 = vpop.f32.mrb[14].mxu1 }
 0x3bb   : > { %v1128_v3 = vpop.f32.mrb[15].mxu1  ;;  %v791_v4 = vsel %vm1771_vm6, %v790_v63, -10000.0 }
 0x3bc   : > { %v792_v5 = vsel %vm399_vm1, %v791_v4, -inf }
 0x3bd   : > { %793 = vmax.xlane.f32.xlu1 %v792_v5 }
 0x3cb   : > { %580 = vrot.lane.b32.xlu0 %v1061_v6, %s1464_s28 }
 0x3ce   : > { %692 = vrot.lane.b32.xlu1 %v1061_v6, %s1466_s17 }
 0x43a   : > { %v567_v7 = vpop.xlane.xlu1 %566 }
 0x43b   : > { %v568_v8 = vsub.f32 %v564_v53, %v567_v7 }
 0x43d   : > { %v569_v9 = vmul.f32 1.442695, %v568_v8 }
 0x43f   : > { %1218 = vpow2.f32 %v569_v9 }
 0x442   : > { %v682_v10 = vpop.xlane.xlu0 %681 }
 0x443   : > { %v683_v11 = vsub.f32 %v679_v60, %v682_v10 }
 0x445   : > { %v684_v12 = vmul.f32 1.442695, %v683_v11 }
 0x446   : > { %v581_v22 = vpop.permute.xlu0 %580 }
 0x447   : > { %1220 = vpow2.f32 %v684_v12  ;;  %v586_v23 = vsel %vm463_vm7, %v581_v22, 0 }
 0x448   : > { %1106 = vmatpush3.bf16.msra.mxu0 %v586_v23 }
 0x449   : > { %v1219_v13 = vpop.eup %1218  ;;  %1117 = vmatprep.subr.bf16.mxu0 %v1461_v0 }
 0x44a   : > { %v794_v14 = vpop.xlane.xlu1 %793  ;;  %v571_v15 = vsel %vm399_vm1, %v1219_v13, 0.0 }
 0x44b   : > { %v795_v16 = vsub.f32 %v791_v4, %v794_v14  ;;  %572 = vadd.xlane.f32.xlu1 %v571_v15 }
 0x44d   : > { %v796_v17 = vmul.f32 1.442695, %v795_v16 }
 0x44e   : > { %v693_v24 = vpop.permute.xlu1 %692 }
 0x44f   : > { %1222 = vpow2.f32 %v796_v17  ;;  %v698_v30 = vsel %vm463_vm7, %v693_v24, 0 }
 0x451   : > { %v1221_v18 = vpop.eup %1220 }
 0x452   : > { %v686_v19 = vsel %vm399_vm1, %v1221_v18, 0.0 }
 0x453   : > { %687 = vadd.xlane.f32.xlu1 %v686_v19 }
 0x459   : > { %v1223_v20 = vpop.eup %1222 }
 0x45a   : > { %v798_v21 = vsel %vm399_vm1, %v1223_v20, 0.0 }
 0x45b   : > { %799 = vadd.xlane.f32.xlu1 %v798_v21 }
 0x46c   : > { %804 = vrot.lane.b32.xlu1 %v1061_v6, %s1465_s14 }
 0x4d8   : > { %v573_v25 = vpop.xlane.xlu1 %572 }
 0x4d9   : > { %1224 = vrcp.f32 %v573_v25 }
 0x4e0   : > { %v688_v26 = vpop.xlane.xlu1 %687 }
 0x4e1   : > { %1226 = vrcp.f32 %v688_v26 }
 0x4e3   : > { %v1225_v27 = vpop.eup %1224 }
 0x4e4   : > { %v575_v28 = vmul.f32 %v1225_v27, %v1219_v13 }
 0x4e6   : > { %v576_v29 = vpack.c.bf16 %v575_v28, %v575_v28 }
 0x4e8   : > { %v800_v31 = vpop.xlane.xlu1 %799  ;;  %1108 = vmatmul.mubr.msk.bf16.vlgmr.msra.gmra.mrb[4].mxu0 %vm399_vm1, %v576_v29 }
 0x4e9   : > { %1228 = vrcp.f32 %v800_v31  ;;  %1118 = vmatpush3.bf16.msra.mxu0 %v698_v30  ;;  %1119 = vmatprep.mubr.msk.bf16.mxu0 %vm1462_vm0, %v1461_v0 }
 0x4ea   : > { %1129 = vmatprep.subr.bf16.mxu0 %v1461_v0 }
 0x4eb   : > { %v1227_v32 = vpop.eup %1226 }
 0x4ec   : > { %v690_v33 = vmul.f32 %v1227_v32, %v1221_v18  ;;  %v805_v34 = vpop.permute.xlu1 %804 }
 0x4ed   : > { %v810_v35 = vsel %vm463_vm7, %v805_v34, 0 }
 0x4ee   : > { %v691_v36 = vpack.c.bf16 %v690_v33, %v690_v33 }
 0x4f0   : > { %1120 = vmatmul.mubr.msk.bf16.vlgmr.msra.gmra.mrb[8].mxu0 %vm399_vm1, %v691_v36 }
 0x4f1   : > { %1130 = vmatpush3.bf16.msra.mxu0 %v810_v35  ;;  %1131 = vmatprep.mubr.msk.bf16.mxu0 %vm1462_vm0, %v1461_v0 }
 0x4f3   : > { %v1229_v37 = vpop.eup %1228 }
 0x4f4   : > { %v802_v38 = vmul.f32 %v1229_v37, %v1223_v20 }
 0x4f6   : > { %v803_v39 = vpack.c.bf16 %v802_v38, %v802_v38 }
 0x4f8   : > { %1132 = vmatmul.mubr.msk.bf16.vlgmr.msra.gmra.mrb[12].mxu0 %vm399_vm1, %v803_v39 }
 0x5bb   : > { %v622_v40 = vpop.f32.mrb[4].mxu0 }
 0x5bc   : > { %853 = vrot.lane.b32.xlu0 %v622_v40, %s1467_s16  ;;  %v1109_v41 = vpop.f32.mrb[5].mxu0 }
 0x5bd   : > { %v625_v42 = vpop.f32.mrb[6].mxu0 }
 0x5be   : > { %v1110_v43 = vpop.f32.mrb[7].mxu0 }
 0x5c3   : > { %v734_v45 = vpop.f32.mrb[8].mxu0 }
 0x5c4   : > { %857 = vrot.lane.b32.xlu1 %v734_v45, %s1468_s13  ;;  %v1121_v46 = vpop.f32.mrb[9].mxu0 }
 0x5c5   : > { %v737_v47 = vpop.f32.mrb[10].mxu0 }
 0x5c6   : > { %v1122_v48 = vpop.f32.mrb[11].mxu0 }
 0x5cb   : > { %v846_v0 = vpop.f32.mrb[12].mxu0 }
 0x5cc   : > { %861 = vrot.lane.b32.xlu0 %v846_v0, %s1469_s12  ;;  %v1133_v49 = vpop.f32.mrb[13].mxu0 }
 0x5cd   : > { %v849_v50 = vpop.f32.mrb[14].mxu0 }
 0x5ce   : > { %v1134_v51 = vpop.f32.mrb[15].mxu0 }
 0x62e   : > { %v854_v52 = vpop.permute.xlu0 %853 }
 0x62f   : > { %v864_v54 = vsel %vm399_vm1, %v1806_v44, %v854_v52 }
 0x636   : > { %v858_v53 = vpop.permute.xlu1 %857 }
 0x637   : > { %v866_v55 = vsel %vm865_vm8, %v864_v54, %v858_v53 }
 0x63e   : > { %v862_v56 = vpop.permute.xlu0 %861 }
 0x63f   : > { %v868_v57 = vsel %vm867_vm9, %v866_v55, %v862_v56 }
 0x640   : > { %870 = vst.msk [vmem:[%s378_s1] sm:$0xff] %vm869_vm10, %v868_v57 }
 0x641   : > { %1393 = shalt.err (!%p1390_p0)
}
 0x642   : > { %s1394_s23 = scalar_lea.hbm %s1845_s20, 128  ;;  %s1398_s24 = scalar_lea.hbm %s1894_s5, 256 }
 0x643   : > { %p1395_p10 = scmp.ne.s32.totalorder %s1845_s20, %s1394_s23  ;;  %p1399_p11 = scmp.lt.u32.totalorder %s1845_s20, %s1894_s5 }
 0x644   : > { %p1400_p6 = scmp.lt.u32.totalorder %s1398_s24, %s1394_s23  ;;  %p1402_p9 = scmp.lt.u32.totalorder %s1394_s23, %s1845_s20 }
 0x645   : > { %p1396_p7 = pnand %p1395_p10, %p1928_p13 }
 0x646   : > { %p1401_p2 = por %p1400_p6, %p1399_p11 }
 0x647   : > { %p1397_p8 = pneg %p1396_p7 }
 0x648   : > { %p1403_p4 = por %p1402_p9, %p1401_p2 }
 0x64a   : > { %p1404_p1 = pnand %p1403_p4, %p1397_p8 }
 0x64c   : > { %1407 = shalt.err (!%p1404_p1)
}
 0x64d   : > { %1145 = dma.vmem_to_hbm [thread:$0]  (%p1928_p13), %s1847_s8, 128, %s1845_s20, %s872_s22  }
 0x64e PF: > { %s1929_s7 = sld [smem:[#allocation19_spill]]  ;;  %s897_s14 = sand.u32 1, %s1442_s18  }
 0x64f   : > { %p1931_p12 = scmp.ge.s32.totalorder %s1454_s21, 2  ;;  %s898_s17 = scalar_lea.sflag [#allocation4], %s897_s14 }
 0x654   : > { %p1930_p3 = scmp.ne.s32.totalorder %s1929_s7, 0 }
 0x656   : > { %p1164_p5 = pnand %p1931_p12, %p1930_p3 }
 0x658   : > { %1437 = dma.done.wait (!%p1164_p5), %s898_s17, 128  }
 0x659   : > { %1439 = vsyncadd (!%p1164_p5), %s898_s17, 4294967168  ;;  %s1932_s21 = sld [smem:[#allocation17_spill]]  ;;  %s1933_s16 = sld [smem:[#allocation16_spill]] }
 0x65a   : > { %s1934_s20 = sld [smem:[#allocation18_spill]]  ;;  %s1935_s18 = smov %s1446_s19 }
 0x65f   : > { %p24_p0 = scmp.ge.s32.totalorder %s1932_s21, 4   ;;  %s1936_s19 = smov %s1933_s16 }
 0x661   :  { %26 = sbr.rel (!%p24_p0) target bundleno = 12 (0xc), region = 133 }
 0x668   :  { %903 = vsyncpa [#allocation3], 1 }
 0x669   :  { %905 = vsyncpa [#allocation3 + $0x1], 1 }
 0x66a   :  { %906 = vsyncpa [#allocation6], 1 }
 0x66b   :  { %908 = vsyncpa [#allocation6 + $0x1], 1 }
 0x66c   :  { %909 = vsyncpa [#allocation9], 1 }
 0x66d   :  { %911 = vsyncpa [#allocation9 + $0x1], 1 }
 0x66e   :  { %912 = vsyncpa [#allocation4], 1 }
 0x66f   :  { %914 = vsyncpa [#allocation4 + $0x1], 1 }

// kernel: _lambda_.43
= control target key start
LH: loop header
LB: loop body
LE: loop exit
PB: predicated region body
PF: predicated region fallthrough
CT: control target
= control target key end

     0   :  { %8 = vsyncpa [#allocation4], 0  ;;  %s453_s0 = inlined_call_operand.hbm [shape: bf16[16,128], index: 0, kind: input, shape index: {}]   ;;  %s454_s1 = inlined_call_operand.hbm [shape: bf16[128,128], index: 1, kind: input, shape index: {}]   ;;  %s455_s2 = inlined_call_operand.hbm [shape: f32[1,128], index: 2, kind: input, shape index: {}]   ;;  %s456_s3 = inlined_call_operand.hbm [shape: f32[16,128], index: 3, kind: output, shape index: {}]  }
   0x1   :  { %9 = vsyncpa [#allocation7], 0 }
   0x2   :  { %10 = vsyncpa [#allocation5], 0  ;;  %s368_s12 = smov [#allocation6]   ;;  %s369_s14 = smov [#allocation3]  }
   0x3   :  { %s28_s13 = sshll.u32 %s368_s12, 4  ;;  %s16_s15 = sshll.u32 %s369_s14, 4  ;;  %s29_s13 = int_to_ptr.vmem [resolvable:$true] %s28_s13  ;;  %s398_s15 = int_to_ptr.vmem [resolvable:$true] %s16_s15 }
   0x4   :  { %s274_s18 = scalar_lea.hbm %s454_s1, 1024 }
   0x5   :  { %p275_p0 = scmp.ne.s32.totalorder %s454_s1, %s274_s18  ;;  %p278_p1 = scmp.lt.u32.totalorder %s274_s18, %s454_s1 }
   0x7   :  { %p280_p2 = pnand %p278_p1, %p275_p0 }
   0x9   :  { %283 = shalt.err (!%p280_p2)
}
   0xa   :  { %s284_s23 = scalar_lea.vmem %s29_s13, 1024  ;;  %p289_p4 = scmp.lt.s32.totalorder %s29_s13, %s29_s13 }
   0xb   :  { %p285_p3 = scmp.ne.s32.totalorder %s29_s13, %s284_s23  ;;  %p290_p5 = scmp.lt.s32.totalorder %s284_s23, %s284_s23 }
   0xd   :  { %p291_p6 = por %p290_p5, %p289_p4 }
   0xf   :  { %p292_p7 = pnand %p291_p6, %p285_p3 }
  0x11   :  { %295 = shalt.err (!%p292_p7)
}
  0x12   :  { %s370_s24 = smov 64   ;;  %s371_s25 = smov 4  }
  0x13   :  { %34 = dma.hbm_to_vmem [thread:$0]  %s454_s1, 1024, %s29_s13, [#allocation7], %s370_s24, %s370_s24, %s371_s25  }
  0x14   :  { %s296_s30 = scalar_lea.hbm %s453_s0, 128 }
  0x15   :  { %p297_p8 = scmp.ne.s32.totalorder %s453_s0, %s296_s30  ;;  %p300_p9 = scmp.lt.u32.totalorder %s296_s30, %s453_s0 }
  0x17   :  { %p302_p10 = pnand %p300_p9, %p297_p8 }
  0x19   :  { %305 = shalt.err (!%p302_p10)
}
  0x1a   :  { %s306_s8 = scalar_lea.vmem %s398_s15, 128  ;;  %p311_p12 = scmp.lt.s32.totalorder %s398_s15, %s398_s15 }
  0x1b   :  { %p307_p11 = scmp.ne.s32.totalorder %s398_s15, %s306_s8  ;;  %p312_p13 = scmp.lt.s32.totalorder %s306_s8, %s306_s8 }
  0x1d   :  { %p313_p0 = por %p312_p13, %p311_p12 }
  0x1f   :  { %p314_p1 = pnand %p313_p0, %p307_p11 }
  0x21   :  { %317 = shalt.err (!%p314_p1)
}
  0x22   :  { %22 = dma.hbm_to_vmem [thread:$0]  %s453_s0, 128, %s398_s15, [#allocation4], %s370_s24, %s370_s24, %s371_s25  }
  0x23   :  { %s372_s10 = smov [#allocation8]   ;;  %s318_s14 = scalar_lea.hbm %s455_s2, 16 }
  0x24   :  { %s41_s11 = sshll.u32 %s372_s10, 4  ;;  %p319_p2 = scmp.ne.s32.totalorder %s455_s2, %s318_s14  ;;  %s42_s11 = int_to_ptr.vmem [resolvable:$true] %s41_s11 }
  0x25   :  { %p322_p3 = scmp.lt.u32.totalorder %s318_s14, %s455_s2 }
  0x27   :  { %p324_p4 = pnand %p322_p3, %p319_p2 }
  0x29   :  { %327 = shalt.err (!%p324_p4)
}
  0x2a   :  { %s328_s20 = scalar_lea.vmem %s42_s11, 16  ;;  %s332_s0 = scalar_lea.vmem %s42_s11, 32 }
  0x2b   :  { %p329_p5 = scmp.ne.s32.totalorder %s42_s11, %s328_s20  ;;  %p333_p6 = scmp.lt.s32.totalorder %s42_s11, %s42_s11 }
  0x2c   :  { %p334_p7 = scmp.lt.s32.totalorder %s332_s0, %s328_s20 }
  0x2e   :  { %p335_p8 = por %p334_p7, %p333_p6 }
  0x30   :  { %p336_p9 = pnand %p335_p8, %p329_p5 }
  0x32   :  { %339 = shalt.err (!%p336_p9)
}
  0x33   :  { %44 = dma.hbm_to_vmem [thread:$0]  %s455_s2, 16, %s42_s11, [#allocation7]  }
  0x34   :  { %362 = dma.done.wait [#allocation4], 128  }
  0x35   :  { %363 = vsyncadd [#allocation4], 4294967168 }
  0x36   :  { %364 = dma.done.wait [#allocation7], 1040  }
  0x37   :  { %365 = vsyncadd [#allocation7], 4294966256  ;;  %v373_v0 = vmov 0.0   ;;  %vm374_vm0 = vmmov 0   ;;  %v265_v1 = vld [vmem:[#allocation6] sm:$0xff]   ;;  %v266_v2 = vld [vmem:[#allocation6 + $0x8] sm:$0xff]  }
  0x38   :  { %235 = vmatprep.subr.bf16.mxu0 %v373_v0  ;;  %251 = vmatprep.mubr.msk.bf16.mxu0 %vm374_vm0, %v373_v0  ;;  %v267_v3 = vld [vmem:[#allocation6 + $0x10] sm:$0xff]   ;;  %v268_v4 = vld [vmem:[#allocation6 + $0x18] sm:$0xff]   ;;  %v269_v5 = vld [vmem:[#allocation6 + $0x20] sm:$0xff]   ;;  %s375_s2 = smov [#allocation9]  }
  0x39   :  { %236 = vmatpush3.bf16.xpose.msra.mxu0 %v265_v1  ;;  %v270_v6 = vld [vmem:[#allocation6 + $0x28] sm:$0xff]   ;;  %v271_v7 = vld [vmem:[#allocation6 + $0x30] sm:$0xff]   ;;  %v272_v8 = vld [vmem:[#allocation6 + $0x38] sm:$0xff]   ;;  %s203_s22 = sshll.u32 %s375_s2, 4  ;;  %s204_s22 = int_to_ptr.vmem [resolvable:$true] %s203_s22 }
  0x3a   :  { %237 = vmatprep.subr.bf16.mxu0 %v373_v0  ;;  %v273_v9 = vld [vmem:[#allocation3] sm:$0xff]   ;;  %v225_v10 = vld [vmem:[#allocation8] ss:$0 sm:$0xff]  ;;  %s340_s23 = scalar_lea.vmem %s204_s22, 256  ;;  %p345_p11 = scmp.lt.s32.totalorder %s204_s22, %s204_s22 }
  0x3b   :  { %p341_p10 = scmp.ne.s32.totalorder %s204_s22, %s340_s23  ;;  %p346_p12 = scmp.lt.s32.totalorder %s340_s23, %s340_s23 }
  0x3d   :  { %p347_p13 = por %p346_p12, %p345_p11 }
  0x3f   :  { %p348_p0 = pnand %p347_p13, %p341_p10 }
  0x41   :  { %238 = vmatpush3.bf16.xpose.msra.mxu0 %v266_v2 }
  0x42   :  { %239 = vmatprep.subr.bf16.mxu0 %v373_v0 }
  0x49   :  { %240 = vmatpush3.bf16.xpose.msra.mxu0 %v267_v3 }
  0x4a   :  { %241 = vmatprep.subr.bf16.mxu0 %v373_v0 }
  0x51   :  { %242 = vmatpush3.bf16.xpose.msra.mxu0 %v268_v4 }
  0x52   :  { %243 = vmatprep.subr.bf16.mxu0 %v373_v0 }
  0x59   :  { %244 = vmatpush3.bf16.xpose.msra.mxu0 %v269_v5 }
  0x5a   :  { %245 = vmatprep.subr.bf16.mxu0 %v373_v0 }
  0x61   :  { %246 = vmatpush3.bf16.xpose.msra.mxu0 %v270_v6 }
  0x62   :  { %247 = vmatprep.subr.bf16.mxu0 %v373_v0 }
  0x69   :  { %248 = vmatpush3.bf16.xpose.msra.mxu0 %v271_v7 }
  0x6a   :  { %249 = vmatprep.subr.bf16.mxu0 %v373_v0 }
  0x71   :  { %250 = vmatpush3.bf16.xpose.msra.mxu0 %v272_v8 }
  0x78   :  { %252 = vmatmul.mubr.bf16.vlgmr.msra.gmra.mrb[0].mxu0 %v273_v9 }
 0x14b   :  { %v169_v11 = vpop.f32.mrb[0].mxu0 }
 0x14c   :  { %v192_v12 = vadd.f32 %v225_v10, %v169_v11  ;;  %v253_v13 = vpop.f32.mrb[1].mxu0 }
 0x14d   :  { %v172_v14 = vpop.f32.mrb[2].mxu0 }
 0x14e   :  { %v194_v15 = vmax.f32 %v192_v12, 0.0  ;;  %v193_v16 = vadd.f32 %v225_v10, %v172_v14  ;;  %v254_v17 = vpop.f32.mrb[3].mxu0 }
 0x150   :  { %196 = vst [vmem:[#allocation9] sm:$0xff] %v194_v15  ;;  %v195_v18 = vmax.f32 %v193_v16, 0.0 }
 0x152   :  { %197 = vst [vmem:[#allocation9 + $0x8] sm:$0xff] %v195_v18 }
 0x153   :  { %351 = shalt.err (!%p348_p0)
}
 0x154   :  { %s352_s26 = scalar_lea.hbm %s456_s3, 256 }
 0x155   :  { %p353_p1 = scmp.ne.s32.totalorder %s456_s3, %s352_s26  ;;  %p356_p2 = scmp.lt.u32.totalorder %s352_s26, %s456_s3 }
 0x157   :  { %p358_p3 = pnand %p356_p2, %p353_p1 }
 0x159   :  { %361 = shalt.err (!%p358_p3)
}
 0x15a   :  { %s376_s4 = smov 128   ;;  %s377_s5 = smov 8  }
 0x15b   :  { %209 = dma.vmem_to_hbm [thread:$0]  %s204_s22, 256, %s456_s3, [#allocation5], %s376_s4, %s376_s4, %s377_s5  }
 0x15c   :  { %366 = dma.done.wait [#allocation5], 256  }
 0x15d   :  { %367 = vsyncadd [#allocation5], 4294967040 }
 0x15e   :  { %213 = vsyncpa [#allocation4], 1 }
 0x15f   :  { %214 = vsyncpa [#allocation7], 1 }
 0x160   :  { %215 = vsyncpa [#allocation5], 1 }

// kernel: _lambda_.54
= control target key start
LH: loop header
LB: loop body
LE: loop exit
PB: predicated region body
PF: predicated region fallthrough
CT: control target
= control target key end

     0   :  { %s1895_s0 = inlined_call_operand.hbm [shape: bf16[2,8,32], index: 0, kind: input, shape index: {}]   ;;  %s1896_s1 = inlined_call_operand.hbm [shape: bf16[2,8,32], index: 1, kind: input, shape index: {}]   ;;  %s1897_s2 = inlined_call_operand.hbm [shape: bf16[2,8,32], index: 2, kind: input, shape index: {}]   ;;  %s1898_s3 = inlined_call_operand.hbm [shape: s32[2,8,1], index: 3, kind: input, shape index: {}]   ;;  %s1899_s4 = inlined_call_operand.hbm [shape: s32[2,1,8], index: 4, kind: input, shape index: {}]   ;;  %s1900_s5 = inlined_call_operand.hbm [shape: f32[2,8,32], index: 5, kind: output, shape index: {}]  }
   0x1   :  { %1911 = sst [smem:[#allocation20_spill]] %s1896_s1 }
   0x2   :  { %1912 = sst [smem:[#allocation21_spill]] %s1898_s3 }
   0x3   :  { %10 = vsyncpa [#allocation3], 0 }
   0x4   :  { %12 = vsyncpa [#allocation3 + $0x1], 0 }
   0x5   :  { %13 = vsyncpa [#allocation6], 0 }
   0x6   :  { %15 = vsyncpa [#allocation6 + $0x1], 0 }
   0x7   :  { %16 = vsyncpa [#allocation9], 0 }
   0x8   :  { %18 = vsyncpa [#allocation9 + $0x1], 0 }
   0x9   :  { %19 = vsyncpa [#allocation4], 0 }
   0xa   :  { %21 = vsyncpa [#allocation4 + $0x1], 0  ;;  %s1507_s18 = smov 0   ;;  %s1509_s19 = smov 0  }
   0xb   :  { %s1511_s20 = smov 0   ;;  %s1513_s21 = smov 0  }
   0xc LB: > { %1913 = sst [smem:[#allocation16_spill]] %s1456_s20  ;;  %s1528_s22 = sadd.s32 4294967295, %s1460_s21   ;;  %s1460_s21 = sphi %s1513_s21, %s1938_s21   ;;  %s1456_s20 = sphi %s1511_s20, %s1940_s20   ;;  %s1452_s19 = sphi %s1509_s19, %s1942_s19   ;;  %s1448_s18 = sphi %s1507_s18, %s1941_s18  }
   0xd   : > { %s1044_s23 = sadd.s32 4294967294, %s1460_s21   ;;  %s1532_s24 = sadd.s32 1, %s1460_s21  }
   0xe   : > { %1914 = sst [smem:[#allocation17_spill]] %s1532_s24  ;;  %s34_s25 = sadd.s32 1, %s1456_s20 }
   0xf   : > { %s31_s26 = ssub.s32 %s1460_s21, %s1532_s24  ;;  %p41_p0 = scmp.ne.s32.totalorder %s1456_s20, %s1452_s19 }
  0x10   : > { %p32_p1 = scmp.eq.s32.totalorder %s31_s26, 0  ;;  %p42_p2 = scmp.eq.s32.totalorder %s1460_s21, 0 }
  0x11   : > { %p47_p3 = scmp.ne.s32.totalorder %s1452_s19, %s1448_s18  ;;  %p48_p4 = scmp.eq.s32.totalorder %s1528_s22, 0 }
  0x12   : > { %s1544_s27 = scalar_select %p32_p1, %s1456_s20, %s34_s25  }
  0x13   : > { %p43_p5 = por %p42_p2, %p41_p0  ;;  %p1546_p6 = por %p48_p4, %p47_p3 }
  0x14   : > { %1915 = sst [smem:[#allocation18_spill]] %s1544_s27  ;;  %p175_p7 = scmp.eq.s32.totalorder %s1528_s22, 1 }
  0x15   : > { %s1916_s28 = scalar_select %p1546_p6, 1, 0 }
  0x16   : > { %p181_p8 = scmp.eq.s32.totalorder %s1044_s23, 1  ;;  %p1173_p10 = scmp.lt.s32.totalorder %s1460_s21, 2 }
  0x17   : > { %p1553_p11 = por %p175_p7, %p41_p0  ;;  %s1562_s6 = sand.u32 1, %s1456_s20  }
  0x18   : > { %p1557_p12 = por %p181_p8, %p47_p3  ;;  %s1565_s7 = sshll.u32 %s1460_s21, 6 }
  0x19   : > { %s1917_s29 = scalar_select %p1553_p11, 1, 0 }
  0x1a   : > { %s1918_s30 = scalar_select %p1557_p12, 1, 0 }
  0x1b   : > { %s1568_s8 = sshll.u32 %s1562_s6, 2  ;;  %p1570_p13 = pnand %p1173_p10, %p43_p5 }
  0x1c   : > { %1919 = sst [smem:[#allocation19_spill]] %s1918_s30  ;;  %s1901_s10 = sand.u32 1, %s1460_s21  }
  0x1d   : > { %s1920_s9 = scalar_select %p1570_p13, 1, 0 }
  0x1e   : > { %s1921_s1 = sld [smem:[#allocation20_spill]]  ;;  %s223_s14 = scalar_lea.vmem [#allocation5], %s1568_s8 }
  0x1f   : > { %s230_s15 = sshll.u32 %s223_s14, 4  ;;  %s1587_s16 = scalar_lea.sflag [#allocation6], %s1901_s10  ;;  %s1582_s15 = int_to_ptr.vmem [resolvable:$true] %s230_s15 }
  0x20   : > { %p1593_p2 = pneg %p1570_p13 }
  0x24   : > { %s1579_s13 = scalar_lea.hbm %s1921_s1, %s1565_s7  ;;  %s1241_s11 = scalar_lea.hbm %s1921_s1, 128 }
  0x25   : > { %s1236_s17 = scalar_lea.hbm %s1579_s13, 64  ;;  %p1242_p5 = scmp.lt.u32.totalorder %s1579_s13, %s1921_s1 }
  0x26   : > { %p1237_p1 = scmp.ne.s32.totalorder %s1579_s13, %s1236_s17  ;;  %p1243_p7 = scmp.lt.u32.totalorder %s1241_s11, %s1236_s17 }
  0x27   : > { %p1245_p10 = scmp.lt.u32.totalorder %s1236_s17, %s1579_s13 }
  0x28   : > { %p1239_p3 = pnand %p1593_p2, %p1237_p1  ;;  %p1244_p8 = por %p1243_p7, %p1242_p5 }
  0x2a   : > { %p1240_p4 = pneg %p1239_p3  ;;  %p1246_p9 = por %p1245_p10, %p1244_p8 }
  0x2c   : > { %p1247_p0 = pnand %p1246_p9, %p1240_p4 }
  0x2e   : > { %1250 = shalt.err (!%p1247_p0)
}
  0x2f   : > { %s1251_s10 = scalar_lea.vmem %s1582_s15, 64  ;;  %s1462_s25 = smov [#allocation5]  }
  0x30   : > { %p1252_p1 = scmp.ne.s32.totalorder %s1582_s15, %s1251_s10  ;;  %s1256_s26 = sshll.u32 %s1462_s25, 4  ;;  %s1257_s26 = int_to_ptr.vmem [resolvable:$false] %s1256_s26 }
  0x31   : > { %s1258_s12 = scalar_lea.vmem %s1257_s26, 128  ;;  %p1259_p11 = scmp.lt.s32.totalorder %s1582_s15, %s1257_s26 }
  0x32   : > { %p1254_p3 = pnand %p1252_p1, %p1593_p2  ;;  %p1260_p6 = scmp.lt.s32.totalorder %s1258_s12, %s1251_s10 }
  0x34   : > { %p1255_p12 = pneg %p1254_p3  ;;  %p1261_p5 = por %p1260_p6, %p1259_p11 }
  0x36   : > { %p1262_p7 = pnand %p1261_p5, %p1255_p12 }
  0x38   : > { %1265 = shalt.err (!%p1262_p7)
}
  0x39   : > { %1159 = dma.hbm_to_vmem [thread:$0]  (!%p1570_p13), %s1579_s13, 64, %s1582_s15, %s1587_s16  }
  0x3a   : > { %p288_p9 = scmp.lt.s32.totalorder %s1460_s21, 3  ;;  %s1053_s17 = sshll.u32 %s1562_s6, 3 }
  0x3b   : > { %s1054_s11 = sshll.u32 %s1460_s21, 7  ;;  %p1923_p0 = scmp.ge.s32.totalorder %s1460_s21, 1 }
  0x3c   : > { %s1925_s3 = sld [smem:[#allocation21_spill]]  ;;  %s259_s12 = scalar_lea.vmem [#allocation8], %s1053_s17 }
  0x3d   : > { %p1622_p4 = pnand %p1923_p0, %p288_p9  ;;  %s266_s1 = sshll.u32 %s259_s12, 4  ;;  %s267_s1 = int_to_ptr.vmem [resolvable:$true] %s266_s1 }
  0x3e   : > { %s1926_s13 = sand.u32 1, %s1460_s21  }
  0x3f   : > { %s1924_s10 = scalar_select %p1622_p4, 1, 0 }
  0x40   : > { %s1633_s15 = scalar_lea.sflag [#allocation9], %s1926_s13 }
  0x42   : > { %s1629_s26 = scalar_lea.hbm %s1925_s3, %s1054_s11  ;;  %s1271_s11 = scalar_lea.hbm %s1925_s3, 256 }
  0x43   : > { %s1266_s27 = scalar_lea.hbm %s1629_s26, 128  ;;  %p1272_p8 = scmp.lt.u32.totalorder %s1629_s26, %s1925_s3 }
  0x44   : > { %p1267_p6 = scmp.ne.s32.totalorder %s1629_s26, %s1266_s27  ;;  %p1273_p10 = scmp.lt.u32.totalorder %s1271_s11, %s1266_s27 }
  0x45   : > { %p1275_p3 = scmp.lt.u32.totalorder %s1266_s27, %s1629_s26 }
  0x46   : > { %p1269_p11 = pnand %p1267_p6, %p1593_p2  ;;  %p1274_p1 = por %p1273_p10, %p1272_p8 }
  0x48   : > { %p1270_p12 = pneg %p1269_p11  ;;  %p1276_p5 = por %p1275_p3, %p1274_p1 }
  0x4a   : > { %p1277_p7 = pnand %p1276_p5, %p1270_p12 }
  0x4c   : > { %1280 = shalt.err (!%p1277_p7)
}
  0x4d   : > { %s1281_s17 = scalar_lea.vmem %s267_s1, 128  ;;  %s1463_s12 = smov [#allocation8]  }
  0x4e   : > { %p1282_p9 = scmp.ne.s32.totalorder %s267_s1, %s1281_s17  ;;  %s1286_s13 = sshll.u32 %s1463_s12, 4  ;;  %s1287_s13 = int_to_ptr.vmem [resolvable:$false] %s1286_s13 }
  0x4f   : > { %s1288_s20 = scalar_lea.vmem %s1287_s13, 256  ;;  %p1289_p11 = scmp.lt.s32.totalorder %s267_s1, %s1287_s13 }
  0x50   : > { %p1284_p0 = pnand %p1282_p9, %p1593_p2  ;;  %p1290_p4 = scmp.lt.s32.totalorder %s1288_s20, %s1281_s17 }
  0x52   : > { %p1285_p6 = pneg %p1284_p0  ;;  %p1291_p13 = por %p1290_p4, %p1289_p11 }
  0x54   : > { %p1292_p8 = pnand %p1291_p13, %p1285_p6 }
  0x56   : > { %1295 = shalt.err (!%p1292_p8)
}
  0x57   : > { %p1927_p10 = scmp.ne.s32.totalorder %s1920_s9, 0  ;;  %s1657_s11 = scalar_lea.hbm %s1895_s0, %s1565_s7 }
  0x58   : > { %s205_s14 = scalar_lea.vmem [#allocation2], %s1568_s8  ;;  %s1666_s13 = scalar_lea.hbm %s1897_s2, %s1565_s7 }
  0x59   : > { %1165 = dma.hbm_to_vmem [thread:$0]  (!%p1927_p10), %s1629_s26, 128, %s267_s1, %s1633_s15  }
  0x5a   : > { %s212_s25 = sshll.u32 %s205_s14, 4  ;;  %s202_s20 = scalar_lea.sflag [#allocation3], %s1562_s6  ;;  %s1660_s25 = int_to_ptr.vmem [resolvable:$true] %s212_s25 }
  0x5b   : > { %s1296_s1 = scalar_lea.hbm %s1657_s11, 64  ;;  %s1301_s27 = scalar_lea.hbm %s1895_s0, 128 }
  0x5c   : > { %p1297_p13 = scmp.ne.s32.totalorder %s1657_s11, %s1296_s1  ;;  %p1302_p1 = scmp.lt.u32.totalorder %s1657_s11, %s1895_s0 }
  0x5d   : > { %p1303_p3 = scmp.lt.u32.totalorder %s1301_s27, %s1296_s1  ;;  %p1305_p7 = scmp.lt.u32.totalorder %s1296_s1, %s1657_s11 }
  0x5e   : > { %p1299_p4 = pnand %p1297_p13, %p1593_p2 }
  0x5f   : > { %p1304_p5 = por %p1303_p3, %p1302_p1 }
  0x60   : > { %p1300_p12 = pneg %p1299_p4 }
  0x61   : > { %p1306_p9 = por %p1305_p7, %p1304_p5 }
  0x63   : > { %p1307_p0 = pnand %p1306_p9, %p1300_p12 }
  0x65   : > { %1310 = shalt.err (!%p1307_p0)
}
  0x66   : > { %s1311_s7 = scalar_lea.vmem %s1660_s25, 64  ;;  %s1464_s14 = smov [#allocation2]  }
  0x67   : > { %p1312_p6 = scmp.ne.s32.totalorder %s1660_s25, %s1311_s7  ;;  %s1316_s17 = sshll.u32 %s1464_s14, 4  ;;  %s1317_s17 = int_to_ptr.vmem [resolvable:$false] %s1316_s17 }
  0x68   : > { %s1318_s3 = scalar_lea.vmem %s1317_s17, 128  ;;  %p1319_p13 = scmp.lt.s32.totalorder %s1660_s25, %s1317_s17 }
  0x69   : > { %p1314_p11 = pnand %p1312_p6, %p1593_p2  ;;  %p1320_p4 = scmp.lt.s32.totalorder %s1318_s3, %s1311_s7 }
  0x6b   : > { %p1315_p8 = pneg %p1314_p11  ;;  %p1321_p1 = por %p1320_p4, %p1319_p13 }
  0x6d   : > { %p1322_p3 = pnand %p1321_p1, %p1315_p8 }
  0x6f   : > { %1325 = shalt.err (!%p1322_p3)
}
  0x70   : > { %1156 = dma.hbm_to_vmem [thread:$0]  (!%p1927_p10), %s1657_s11, 64, %s1660_s25, %s202_s20  }
  0x71   : > { %s241_s30 = scalar_lea.vmem [#allocation7], %s1568_s8  ;;  %s1055_s1 = sshll.u32 %s1460_s21, 4 }
  0x72   : > { %s248_s12 = sshll.u32 %s241_s30, 4  ;;  %s1326_s26 = scalar_lea.hbm %s1666_s13, 64  ;;  %s249_s12 = int_to_ptr.vmem [resolvable:$true] %s248_s12 }
  0x73   : > { %p1327_p12 = scmp.ne.s32.totalorder %s1666_s13, %s1326_s26  ;;  %s1331_s7 = scalar_lea.hbm %s1897_s2, 128 }
  0x74   : > { %p1332_p9 = scmp.lt.u32.totalorder %s1666_s13, %s1897_s2  ;;  %p1333_p0 = scmp.lt.u32.totalorder %s1331_s7, %s1326_s26 }
  0x75   : > { %p1329_p5 = pnand %p1327_p12, %p1593_p2  ;;  %p1335_p11 = scmp.lt.u32.totalorder %s1326_s26, %s1666_s13 }
  0x76   : > { %p1334_p6 = por %p1333_p0, %p1332_p9 }
  0x77   : > { %p1330_p7 = pneg %p1329_p5 }
  0x78   : > { %p1336_p8 = por %p1335_p11, %p1334_p6 }
  0x7a   : > { %p1337_p13 = pnand %p1336_p8, %p1330_p7 }
  0x7c   : > { %1340 = shalt.err (!%p1337_p13)
}
  0x7d   : > { %s1341_s8 = scalar_lea.vmem %s249_s12, 64  ;;  %s1465_s11 = smov [#allocation7]  }
  0x7e   : > { %p1342_p4 = scmp.ne.s32.totalorder %s249_s12, %s1341_s8  ;;  %s1346_s25 = sshll.u32 %s1465_s11, 4  ;;  %s1347_s25 = int_to_ptr.vmem [resolvable:$false] %s1346_s25 }
  0x7f   : > { %s1348_s20 = scalar_lea.vmem %s1347_s25, 128  ;;  %p1349_p12 = scmp.lt.s32.totalorder %s249_s12, %s1347_s25 }
  0x80   : > { %p1344_p1 = pnand %p1342_p4, %p1593_p2  ;;  %p1350_p5 = scmp.lt.s32.totalorder %s1348_s20, %s1341_s8 }
  0x82   : > { %p1345_p3 = pneg %p1344_p1  ;;  %p1351_p10 = por %p1350_p5, %p1349_p12 }
  0x84   : > { %p1352_p0 = pnand %p1351_p10, %p1345_p3 }
  0x86   : > { %1355 = shalt.err (!%p1352_p0)
}
  0x87   : > { %p1928_p9 = scmp.ne.s32.totalorder %s1920_s9, 0  ;;  %s1713_s26 = scalar_lea.hbm %s1899_s4, %s1055_s1 }
  0x88   : > { %s276_s24 = scalar_lea.vmem [#allocation10], %s1562_s6  ;;  %s1356_s7 = scalar_lea.hbm %s1713_s26, 16 }
  0x89   : > { %1162 = dma.hbm_to_vmem [thread:$0]  (!%p1928_p9), %s1666_s13, 64, %s249_s12, %s1587_s16  }
  0x8a   : > { %s283_s27 = sshll.u32 %s276_s24, 4  ;;  %p1357_p10 = scmp.ne.s32.totalorder %s1713_s26, %s1356_s7  ;;  %s284_s27 = int_to_ptr.vmem [resolvable:$true] %s283_s27 }
  0x8b   : > { %s1361_s16 = scalar_lea.hbm %s1899_s4, 32  ;;  %p1362_p11 = scmp.lt.u32.totalorder %s1713_s26, %s1899_s4 }
  0x8c   : > { %p1359_p7 = pnand %p1357_p10, %p1593_p2  ;;  %p1363_p8 = scmp.lt.u32.totalorder %s1361_s16, %s1356_s7 }
  0x8d   : > { %p1365_p4 = scmp.lt.u32.totalorder %s1356_s7, %s1713_s26 }
  0x8e   : > { %p1360_p6 = pneg %p1359_p7  ;;  %p1364_p13 = por %p1363_p8, %p1362_p11 }
  0x90   : > { %p1366_p1 = por %p1365_p4, %p1364_p13 }
  0x92   : > { %p1367_p3 = pnand %p1366_p1, %p1360_p6 }
  0x94   : > { %1370 = shalt.err (!%p1367_p3)
}
  0x95   : > { %s1371_s6 = scalar_lea.vmem %s284_s27, 16  ;;  %s1466_s1 = smov [#allocation10]  }
  0x96   : > { %p1372_p12 = scmp.ne.s32.totalorder %s284_s27, %s1371_s6  ;;  %s1376_s8 = sshll.u32 %s1466_s1, 4  ;;  %s1377_s8 = int_to_ptr.vmem [resolvable:$false] %s1376_s8 }
  0x97   : > { %s1378_s11 = scalar_lea.vmem %s1377_s8, 32  ;;  %p1379_p10 = scmp.lt.s32.totalorder %s284_s27, %s1377_s8 }
  0x98   : > { %p1374_p5 = pnand %p1372_p12, %p1593_p2  ;;  %p1380_p7 = scmp.lt.s32.totalorder %s1378_s11, %s1371_s6 }
  0x9a   : > { %p1375_p0 = pneg %p1374_p5  ;;  %p1381_p9 = por %p1380_p7, %p1379_p10 }
  0x9c   : > { %p1382_p8 = pnand %p1381_p9, %p1375_p0 }
  0x9e   : > { %1385 = shalt.err (!%p1382_p8)
}
  0x9f   : > { %p1929_p11 = scmp.ne.s32.totalorder %s1920_s9, 0  ;;  %p1930_p6 = scmp.ne.s32.totalorder %s1924_s10, 0 }
  0xa0   : > { %s1737_s23 = sand.u32 (!%p1930_p6), 1, %s1452_s19   ;;  %p1931_p2 = scmp.ne.s32.totalorder (!%p1930_p6), %s1916_s28, 0 }
  0xa1   : > { %1168 = dma.hbm_to_vmem [thread:$0]  (!%p1929_p11), %s1713_s26, 16, %s284_s27, %s1633_s15  }
  0xa2   : > { %292 = sbr.rel (%p1930_p6) target bundleno = 1614 (0x64e), region = 40  ;;  %s1740_s25 = sshll.u32 (!%p1930_p6), %s1737_s23, 2 }
  0xa3   : > { %s295_s20 = scalar_lea.sflag (!%p1930_p6), [#allocation3], %s1737_s23  ;;  %s298_s3 = scalar_lea.vmem (!%p1930_p6), [#allocation2], %s1740_s25 }
  0xa9   : > { %1431 = dma.done.wait (%p1931_p2), %s295_s20, 64  }
  0xaa   : > { %1433 = vsyncadd (%p1931_p2), %s295_s20, 4294967232  ;;  %s303_s9 = sand.u32 1, %s1528_s22   ;;  %s307_s15 = scalar_lea.vmem [#allocation5], %s1740_s25 }
  0xab   : > { %s304_s10 = scalar_lea.sflag [#allocation6], %s303_s9 }
  0xac   : > { %1435 = dma.done.wait (%p1931_p2), %s304_s10, 128  }
  0xad   : > { %1437 = vsyncadd (%p1931_p2), %s304_s10, 4294967168  ;;  %s1060_s30 = sshll.u32 %s1737_s23, 3  ;;  %s316_s26 = scalar_lea.vmem [#allocation7], %s1740_s25 }
  0xae   : > { %s322_s24 = scalar_lea.sflag [#allocation9], %s303_s9  ;;  %s325_s27 = scalar_lea.vmem [#allocation8], %s1060_s30 }
  0xaf   : > { %1439 = dma.done.wait (%p1931_p2), %s322_s24, 144  }
  0xb0   : > { %1441 = vsyncadd (%p1931_p2), %s322_s24, 4294967152  ;;  %v1467_v0 = vmov 0.0   ;;  %vm1468_vm0 = vmmov 0   ;;  %v1469_v1 = vmov 0   ;;  %vm405_vm1 = vcmask 64512   ;;  %v383_v3 = vld [vmem:[%s325_s27] sm:$0xff] }
  0xb1   : > { %1093 = vmatprep.subr.bf16.mxu0 %v1467_v0  ;;  %1095 = vmatprep.mubr.msk.bf16.mxu0 %vm1468_vm0, %v1467_v0  ;;  %v381_v2 = vld [vmem:[%s307_s15] sm:$0xf]  ;;  %vm384_vm2 = vcmp.ne.s32.totalorder %v383_v3, 0  ;;  %v380_v6 = vld [vmem:[%s298_s3] sm:$0xf]  ;;  %s1470_s28 = smov 120   ;;  %v393_v8 = vlaneseq }
  0xb2   : > { %1216 = vset.pattern.permute.xlu0 %v1469_v1  ;;  %1099 = vmatprep.subr.bf16.mxu1 %v1467_v0  ;;  %v410_v4 = vsel %vm405_vm1, %v381_v2, 0  ;;  %v387_v5 = vsel %vm384_vm2, 1, %v1469_v1  ;;  %v1065_v7 = vcombine.low %v381_v2, %v381_v2  ;;  %s333_s7 = scalar_lea.vmem [#allocation10], %s1737_s23  ;;  %v1064_v24 = vcombine.low %v380_v6, %v380_v6  ;;  %s1471_s14 = smov 104   ;;  %v1788_v30 = vld [vmem:[%s316_s26] sm:$0xf] }
  0xb3   : > { %1101 = vmatprep.mubr.msk.bf16.mxu1 %vm1468_vm0, %v1467_v0  ;;  %1094 = vmatpush3.bf16.xpose.msra.mxu0 %v410_v4  ;;  %v385_v9 = vld [vmem:[%s333_s7] sm:$0x1]  ;;  %v394_v10 = vshrl.u32 %v393_v8, 7  ;;  %v402_v15 = vand.u32 127, %v393_v8  ;;  %vm469_vm9 = vcmask 1043456   ;;  %s1472_s17 = smov 112  }
  0xb4   : > { %389 = vperm.xlu0 %1216, %v387_v5   ;;  %1111 = vmatprep.subr.bf16.mxu0 %v1467_v0  ;;  %vm386_vm3 = vcmp.ne.s32.totalorder %v385_v9, 0  ;;  %v471_v31 = vsel %vm469_vm9, %v1788_v30, 0  ;;  %s1473_s16 = smov 8   ;;  %s1474_s13 = smov 16   ;;  %vm871_vm10 = vcmask 130048   ;;  %vm873_vm11 = vcmask 195584  }
  0xb5   : > { %521 = vrot.lane.b32.xlu1 %v1065_v7, %s1470_s28  ;;  %v395_v11 = vsub.s32 0, %v394_v10  ;;  %v392_v12 = vsel %vm386_vm3, 1, %v1469_v1  ;;  %vm403_vm6 = vcmp.ge.s32.totalorder %v394_v10, %v402_v15  ;;  %1100 = vmatpush3.bf16.msra.mxu1 %v471_v31  ;;  %s1475_s12 = smov 24   ;;  %s1074_s6 = sshll.u32 %s1528_s22, 7  ;;  %vm875_vm12 = vcmask 261120  }
  0xb6   : > { %1105 = vmatprep.subr.bf16.mxu1 %v1467_v0  ;;  %s378_s1 = scalar_lea.vmem [#allocation11], %s1060_s30  ;;  %s1851_s20 = scalar_lea.hbm %s1900_s5, %s1074_s6 }
  0xb7   : > { %v396_v13 = vrot.slane %v392_v12, %v395_v11  ;;  %s891_s8 = sshll.u32 %s378_s1, 4  ;;  %s878_s22 = scalar_lea.sflag [#allocation4], %s1737_s23  ;;  %s1853_s8 = int_to_ptr.vmem [resolvable:$true] %s891_s8 }
  0xb8   : > { %s1386_s3 = scalar_lea.vmem %s1853_s8, 128  ;;  %p1934_p13 = scmp.ne.s32.totalorder %s1917_s29, 0 }
  0xb9   : > { %vm397_vm4 = vcmp.eq.s32.totalorder %v396_v13, 1  ;;  %p1387_p9 = scmp.ne.s32.totalorder %s1853_s8, %s1386_s3  ;;  %s1476_s9 = smov [#allocation11]  }
  0xba   : > { %1096 = vmatmul.mubr.msk.bf16.vlgmr.msra.gmra.mrb[0].mxu0 %vm405_vm1, %v380_v6  ;;  %s1390_s10 = sshll.u32 %s1476_s9, 4  ;;  %s1391_s10 = int_to_ptr.vmem [resolvable:$false] %s1390_s10 }
  0xbb   : > { %1113 = vmatprep.mubr.msk.bf16.mxu0 %vm1468_vm0, %v1467_v0  ;;  %p1388_p4 = pnand %p1387_p9, %p1934_p13  ;;  %s1392_s15 = scalar_lea.vmem %s1391_s10, 256 }
  0xbc   : > { %p1393_p3 = scmp.lt.s32.totalorder %s1853_s8, %s1391_s10  ;;  %p1394_p12 = scmp.lt.s32.totalorder %s1392_s15, %s1386_s3 }
  0xbd   : > { %p1389_p1 = pneg %p1388_p4 }
  0xbe   : > { %p1395_p5 = por %p1394_p12, %p1393_p3 }
  0xc0   : > { %p1396_p0 = pnand %p1395_p5, %p1389_p1 }
 0x127   : > { %v522_v32 = vpop.permute.xlu1 %521 }
 0x128   : > { %v527_v39 = vsel %vm405_vm1, %v522_v32, 0 }
 0x133   : > { %v390_v14 = vpop.permute.xlu0 %389 }
 0x134   : > { %vm391_vm5 = vcmp.eq.s32.totalorder %v390_v14, 1 }
 0x135   : > { %vm398_vm7 = vmand %vm391_vm5, %vm397_vm4 }
 0x136   : > { %vm1777_vm8 = vmand %vm398_vm7, %vm403_vm6 }
 0x18d   : > { %v446_v17 = vpop.f32.mrb[0].mxu0 }
 0x18e   : > { %v452_v18 = vmul.f32 0.35355338, %v446_v17  ;;  %v1097_v19 = vpop.f32.mrb[1].mxu0 }
 0x18f   : > { %v449_v20 = vpop.f32.mrb[2].mxu0 }
 0x190   : > { %v1098_v21 = vpop.f32.mrb[3].mxu0  ;;  %v453_v22 = vsel %vm1777_vm8, %v452_v18, -10000.0 }
 0x191   : > { %v454_v23 = vsel %vm405_vm1, %v453_v22, -inf }
 0x192   : > { %455 = vmax.xlane.f32.xlu0 %v454_v23 }
 0x1a8   : > { %746 = vrot.lane.b32.xlu0 %v1064_v24, %s1471_s14 }
 0x21f   : > { %v456_v25 = vpop.xlane.xlu0 %455 }
 0x220   : > { %v457_v26 = vsub.f32 %v453_v22, %v456_v25 }
 0x222   : > { %v458_v27 = vmul.f32 1.442695, %v457_v26 }
 0x223   : > { %v747_v44 = vpop.permute.xlu0 %746 }
 0x224   : > { %1220 = vpow2.f32 %v458_v27 }
 0x22e   : > { %v1221_v28 = vpop.eup %1220 }
 0x22f   : > { %v460_v29 = vsel %vm405_vm1, %v1221_v28, 0.0 }
 0x230   : > { %461 = vadd.xlane.f32.xlu1 %v460_v29 }
 0x241   : > { %516 = vrot.lane.b32.xlu1 %v1064_v24, %s1470_s28 }
 0x245   : > { %636 = vrot.lane.b32.xlu1 %v1065_v7, %s1472_s17 }
 0x249   : > { %634 = vrot.lane.b32.xlu1 %v1064_v24, %s1472_s17 }
 0x24d   : > { %748 = vrot.lane.b32.xlu1 %v1065_v7, %s1471_s14  ;;  %v1067_v7 = vcombine.low %v1788_v30, %v1788_v30 }
 0x2bd   : > { %v462_v33 = vpop.xlane.xlu1 %461 }
 0x2be   : > { %1222 = vrcp.f32 %v462_v33 }
 0x2c1   : > { %v517_v34 = vpop.permute.xlu1 %516 }
 0x2c5   : > { %v637_v38 = vpop.permute.xlu1 %636 }
 0x2c6   : > { %v642_v41 = vsel %vm405_vm1, %v637_v38, 0 }
 0x2c8   : > { %v1223_v35 = vpop.eup %1222 }
 0x2c9   : > { %v464_v36 = vmul.f32 %v1223_v35, %v1221_v28  ;;  %v635_v40 = vpop.permute.xlu1 %634 }
 0x2cb   : > { %v465_v37 = vpack.c.bf16 %v464_v36, %v464_v36 }
 0x2cd   : > { %1102 = vmatmul.mubr.msk.bf16.vlgmr.msra.gmra.mrb[0].mxu1 %vm405_vm1, %v465_v37  ;;  %v749_v42 = vpop.permute.xlu1 %748 }
 0x2ce   : > { %1106 = vmatpush3.bf16.xpose.msra.mxu1 %v527_v39  ;;  %1107 = vmatprep.mubr.msk.bf16.mxu1 %vm1468_vm0, %v1467_v0  ;;  %v754_v43 = vsel %vm405_vm1, %v749_v42, 0 }
 0x2cf   : > { %1117 = vmatprep.subr.bf16.mxu1 %v1467_v0 }
 0x2d5   : > { %1108 = vmatmul.mubr.msk.bf16.vlgmr.msra.gmra.mrb[4].mxu1 %vm405_vm1, %v517_v34 }
 0x2d6   : > { %1118 = vmatpush3.bf16.xpose.msra.mxu1 %v642_v41  ;;  %1119 = vmatprep.mubr.msk.bf16.mxu1 %vm1468_vm0, %v1467_v0 }
 0x2d7   : > { %1129 = vmatprep.subr.bf16.mxu1 %v1467_v0 }
 0x2dd   : > { %1120 = vmatmul.mubr.msk.bf16.vlgmr.msra.gmra.mrb[8].mxu1 %vm405_vm1, %v635_v40 }
 0x2de   : > { %1130 = vmatpush3.bf16.xpose.msra.mxu1 %v754_v43  ;;  %1131 = vmatprep.mubr.msk.bf16.mxu1 %vm1468_vm0, %v1467_v0 }
 0x2e5   : > { %1132 = vmatmul.mubr.msk.bf16.vlgmr.msra.gmra.mrb[12].mxu1 %vm405_vm1, %v747_v44 }
 0x3a0   : > { %v1812_v45 = vpop.f32.mrb[0].mxu1 }
 0x3a1   : > { %v1103_v46 = vpop.f32.mrb[1].mxu1 }
 0x3a2   : > { %v510_v47 = vpop.f32.mrb[2].mxu1 }
 0x3a3   : > { %v1104_v48 = vpop.f32.mrb[3].mxu1 }
 0x3a8   : > { %v563_v49 = vpop.f32.mrb[4].mxu1 }
 0x3a9   : > { %v569_v50 = vmul.f32 0.35355338, %v563_v49  ;;  %v1109_v51 = vpop.f32.mrb[5].mxu1 }
 0x3aa   : > { %v566_v52 = vpop.f32.mrb[6].mxu1 }
 0x3ab   : > { %v1110_v53 = vpop.f32.mrb[7].mxu1  ;;  %v570_v54 = vsel %vm1777_vm8, %v569_v50, -10000.0 }
 0x3ac   : > { %v571_v55 = vsel %vm405_vm1, %v570_v54, -inf }
 0x3ad   : > { %572 = vmax.xlane.f32.xlu1 %v571_v55 }
 0x3b0   : > { %v678_v56 = vpop.f32.mrb[8].mxu1 }
 0x3b1   : > { %v684_v57 = vmul.f32 0.35355338, %v678_v56  ;;  %v1121_v58 = vpop.f32.mrb[9].mxu1 }
 0x3b2   : > { %v681_v59 = vpop.f32.mrb[10].mxu1 }
 0x3b3   : > { %v1122_v60 = vpop.f32.mrb[11].mxu1  ;;  %v685_v61 = vsel %vm1777_vm8, %v684_v57, -10000.0 }
 0x3b4   : > { %v686_v62 = vsel %vm405_vm1, %v685_v61, -inf }
 0x3b5   : > { %687 = vmax.xlane.f32.xlu0 %v686_v62 }
 0x3b8   : > { %v790_v63 = vpop.f32.mrb[12].mxu1 }
 0x3b9   : > { %v796_v1 = vmul.f32 0.35355338, %v790_v63  ;;  %v1133_v2 = vpop.f32.mrb[13].mxu1 }
 0x3ba   : > { %v793_v3 = vpop.f32.mrb[14].mxu1 }
 0x3bb   : > { %v1134_v4 = vpop.f32.mrb[15].mxu1  ;;  %v797_v5 = vsel %vm1777_vm8, %v796_v1, -10000.0 }
 0x3bc   : > { %v798_v6 = vsel %vm405_vm1, %v797_v5, -inf }
 0x3bd   : > { %799 = vmax.xlane.f32.xlu1 %v798_v6 }
 0x3cb   : > { %586 = vrot.lane.b32.xlu0 %v1067_v7, %s1470_s28 }
 0x3ce   : > { %698 = vrot.lane.b32.xlu1 %v1067_v7, %s1472_s17 }
 0x43a   : > { %v573_v8 = vpop.xlane.xlu1 %572 }
 0x43b   : > { %v574_v9 = vsub.f32 %v570_v54, %v573_v8 }
 0x43d   : > { %v575_v10 = vmul.f32 1.442695, %v574_v9 }
 0x43f   : > { %1224 = vpow2.f32 %v575_v10 }
 0x442   : > { %v688_v11 = vpop.xlane.xlu0 %687 }
 0x443   : > { %v689_v12 = vsub.f32 %v685_v61, %v688_v11 }
 0x445   : > { %v690_v13 = vmul.f32 1.442695, %v689_v12 }
 0x446   : > { %v587_v23 = vpop.permute.xlu0 %586 }
 0x447   : > { %1226 = vpow2.f32 %v690_v13  ;;  %v592_v24 = vsel %vm469_vm9, %v587_v23, 0 }
 0x448   : > { %1112 = vmatpush3.bf16.msra.mxu0 %v592_v24 }
 0x449   : > { %v1225_v14 = vpop.eup %1224  ;;  %1123 = vmatprep.subr.bf16.mxu0 %v1467_v0 }
 0x44a   : > { %v800_v15 = vpop.xlane.xlu1 %799  ;;  %v577_v16 = vsel %vm405_vm1, %v1225_v14, 0.0 }
 0x44b   : > { %v801_v17 = vsub.f32 %v797_v5, %v800_v15  ;;  %578 = vadd.xlane.f32.xlu1 %v577_v16 }
 0x44d   : > { %v802_v18 = vmul.f32 1.442695, %v801_v17 }
 0x44e   : > { %v699_v25 = vpop.permute.xlu1 %698 }
 0x44f   : > { %1228 = vpow2.f32 %v802_v18  ;;  %v704_v31 = vsel %vm469_vm9, %v699_v25, 0 }
 0x451   : > { %v1227_v19 = vpop.eup %1226 }
 0x452   : > { %v692_v20 = vsel %vm405_vm1, %v1227_v19, 0.0 }
 0x453   : > { %693 = vadd.xlane.f32.xlu1 %v692_v20 }
 0x459   : > { %v1229_v21 = vpop.eup %1228 }
 0x45a   : > { %v804_v22 = vsel %vm405_vm1, %v1229_v21, 0.0 }
 0x45b   : > { %805 = vadd.xlane.f32.xlu1 %v804_v22 }
 0x46c   : > { %810 = vrot.lane.b32.xlu1 %v1067_v7, %s1471_s14 }
 0x4d8   : > { %v579_v26 = vpop.xlane.xlu1 %578 }
 0x4d9   : > { %1230 = vrcp.f32 %v579_v26 }
 0x4e0   : > { %v694_v27 = vpop.xlane.xlu1 %693 }
 0x4e1   : > { %1232 = vrcp.f32 %v694_v27 }
 0x4e3   : > { %v1231_v28 = vpop.eup %1230 }
 0x4e4   : > { %v581_v29 = vmul.f32 %v1231_v28, %v1225_v14 }
 0x4e6   : > { %v582_v30 = vpack.c.bf16 %v581_v29, %v581_v29 }
 0x4e8   : > { %v806_v32 = vpop.xlane.xlu1 %805  ;;  %1114 = vmatmul.mubr.msk.bf16.vlgmr.msra.gmra.mrb[4].mxu0 %vm405_vm1, %v582_v30 }
 0x4e9   : > { %1234 = vrcp.f32 %v806_v32  ;;  %1124 = vmatpush3.bf16.msra.mxu0 %v704_v31  ;;  %1125 = vmatprep.mubr.msk.bf16.mxu0 %vm1468_vm0, %v1467_v0 }
 0x4ea   : > { %1135 = vmatprep.subr.bf16.mxu0 %v1467_v0 }
 0x4eb   : > { %v1233_v33 = vpop.eup %1232 }
 0x4ec   : > { %v696_v34 = vmul.f32 %v1233_v33, %v1227_v19  ;;  %v811_v35 = vpop.permute.xlu1 %810 }
 0x4ed   : > { %v816_v36 = vsel %vm469_vm9, %v811_v35, 0 }
 0x4ee   : > { %v697_v37 = vpack.c.bf16 %v696_v34, %v696_v34 }
 0x4f0   : > { %1126 = vmatmul.mubr.msk.bf16.vlgmr.msra.gmra.mrb[8].mxu0 %vm405_vm1, %v697_v37 }
 0x4f1   : > { %1136 = vmatpush3.bf16.msra.mxu0 %v816_v36  ;;  %1137 = vmatprep.mubr.msk.bf16.mxu0 %vm1468_vm0, %v1467_v0 }
 0x4f3   : > { %v1235_v38 = vpop.eup %1234 }
 0x4f4   : > { %v808_v39 = vmul.f32 %v1235_v38, %v1229_v21 }
 0x4f6   : > { %v809_v40 = vpack.c.bf16 %v808_v39, %v808_v39 }
 0x4f8   : > { %1138 = vmatmul.mubr.msk.bf16.vlgmr.msra.gmra.mrb[12].mxu0 %vm405_vm1, %v809_v40 }
 0x5bb   : > { %v628_v41 = vpop.f32.mrb[4].mxu0 }
 0x5bc   : > { %859 = vrot.lane.b32.xlu0 %v628_v41, %s1473_s16  ;;  %v1115_v42 = vpop.f32.mrb[5].mxu0 }
 0x5bd   : > { %v631_v43 = vpop.f32.mrb[6].mxu0 }
 0x5be   : > { %v1116_v44 = vpop.f32.mrb[7].mxu0 }
 0x5c3   : > { %v740_v46 = vpop.f32.mrb[8].mxu0 }
 0x5c4   : > { %863 = vrot.lane.b32.xlu1 %v740_v46, %s1474_s13  ;;  %v1127_v47 = vpop.f32.mrb[9].mxu0 }
 0x5c5   : > { %v743_v48 = vpop.f32.mrb[10].mxu0 }
 0x5c6   : > { %v1128_v49 = vpop.f32.mrb[11].mxu0 }
 0x5cb   : > { %v852_v0 = vpop.f32.mrb[12].mxu0 }
 0x5cc   : > { %867 = vrot.lane.b32.xlu0 %v852_v0, %s1475_s12  ;;  %v1139_v50 = vpop.f32.mrb[13].mxu0 }
 0x5cd   : > { %v855_v51 = vpop.f32.mrb[14].mxu0 }
 0x5ce   : > { %v1140_v52 = vpop.f32.mrb[15].mxu0 }
 0x62e   : > { %v860_v53 = vpop.permute.xlu0 %859 }
 0x62f   : > { %v870_v55 = vsel %vm405_vm1, %v1812_v45, %v860_v53 }
 0x636   : > { %v864_v54 = vpop.permute.xlu1 %863 }
 0x637   : > { %v872_v56 = vsel %vm871_vm10, %v870_v55, %v864_v54 }
 0x63e   : > { %v868_v57 = vpop.permute.xlu0 %867 }
 0x63f   : > { %v874_v58 = vsel %vm873_vm11, %v872_v56, %v868_v57 }
 0x640   : > { %876 = vst.msk [vmem:[%s378_s1] sm:$0xff] %vm875_vm12, %v874_v58 }
 0x641   : > { %1399 = shalt.err (!%p1396_p0)
}
 0x642   : > { %s1400_s23 = scalar_lea.hbm %s1851_s20, 128  ;;  %s1404_s24 = scalar_lea.hbm %s1900_s5, 256 }
 0x643   : > { %p1401_p10 = scmp.ne.s32.totalorder %s1851_s20, %s1400_s23  ;;  %p1405_p11 = scmp.lt.u32.totalorder %s1851_s20, %s1900_s5 }
 0x644   : > { %p1406_p6 = scmp.lt.u32.totalorder %s1404_s24, %s1400_s23  ;;  %p1408_p9 = scmp.lt.u32.totalorder %s1400_s23, %s1851_s20 }
 0x645   : > { %p1402_p7 = pnand %p1401_p10, %p1934_p13 }
 0x646   : > { %p1407_p2 = por %p1406_p6, %p1405_p11 }
 0x647   : > { %p1403_p8 = pneg %p1402_p7 }
 0x648   : > { %p1409_p4 = por %p1408_p9, %p1407_p2 }
 0x64a   : > { %p1410_p1 = pnand %p1409_p4, %p1403_p8 }
 0x64c   : > { %1413 = shalt.err (!%p1410_p1)
}
 0x64d   : > { %1151 = dma.vmem_to_hbm [thread:$0]  (%p1934_p13), %s1853_s8, 128, %s1851_s20, %s878_s22  }
 0x64e PF: > { %s1935_s7 = sld [smem:[#allocation19_spill]]  ;;  %s903_s14 = sand.u32 1, %s1448_s18  }
 0x64f   : > { %p1937_p12 = scmp.ge.s32.totalorder %s1460_s21, 2  ;;  %s904_s17 = scalar_lea.sflag [#allocation4], %s903_s14 }
 0x654   : > { %p1936_p3 = scmp.ne.s32.totalorder %s1935_s7, 0 }
 0x656   : > { %p1170_p5 = pnand %p1937_p12, %p1936_p3 }
 0x658   : > { %1443 = dma.done.wait (!%p1170_p5), %s904_s17, 128  }
 0x659   : > { %1445 = vsyncadd (!%p1170_p5), %s904_s17, 4294967168  ;;  %s1938_s21 = sld [smem:[#allocation17_spill]]  ;;  %s1939_s16 = sld [smem:[#allocation16_spill]] }
 0x65a   : > { %s1940_s20 = sld [smem:[#allocation18_spill]]  ;;  %s1941_s18 = smov %s1452_s19 }
 0x65f   : > { %p24_p0 = scmp.ge.s32.totalorder %s1938_s21, 4   ;;  %s1942_s19 = smov %s1939_s16 }
 0x661   :  { %26 = sbr.rel (!%p24_p0) target bundleno = 12 (0xc), region = 133 }
 0x668   :  { %909 = vsyncpa [#allocation3], 1 }
 0x669   :  { %911 = vsyncpa [#allocation3 + $0x1], 1 }
 0x66a   :  { %912 = vsyncpa [#allocation6], 1 }
 0x66b   :  { %914 = vsyncpa [#allocation6 + $0x1], 1 }
 0x66c   :  { %915 = vsyncpa [#allocation9], 1 }
 0x66d   :  { %917 = vsyncpa [#allocation9 + $0x1], 1 }
 0x66e   :  { %918 = vsyncpa [#allocation4], 1 }
 0x66f   :  { %920 = vsyncpa [#allocation4 + $0x1], 1 }

</bundles_post_ra>
